<compile_context>
chip_gen: v5e
topology: v5e:2x2
jax: 0.10.0
libtpu: 0.0.40
codegen_flags: <defaults>
</compile_context>

<pallas_src>
import math
import functools

import jax
import jax.numpy as jnp
from jax.experimental import pallas as pl
from jax.experimental.pallas import tpu as pltpu

HOP = 160        # TODO(synk): HOP constant comes from the original repo (not in snippet).
N_FFT = 495
N_PITCH = 88

_HB = 8                               # time-halo fetch granularity (sublane multiple)
_VMEM_LIMIT = 48 * 1024 * 1024        # scoped VMEM cap (fits v5e/v6e/v7x)
_VMEM_BUDGET = 28 * 1024 * 1024       # conservative per-tile planning budget


def _round_up(x, m):
    return (x + m - 1) // m * m


def _pick_tr(wp, wc, wo, cin, cout, halo, n_taps):
    """Largest time-tile (rows) whose conservative VMEM estimate fits the budget."""
    cin_p = _round_up(max(cin, 1), 128)
    cout_p = _round_up(max(cout, 1), 128)
    hb = _HB if halo > 0 else 0
    for cand in (32, 16, 8):
        x_in = 2 * cand * wp * cin_p * 2                     # double-buffered main x tile
        x_hal = 2 * hb * wp * cin_p * 2                      # double-buffered halo tile
        scr = (cand + hb) * wp * cin_p * 2 if halo else 0    # haloed-window scratch
        out_b = 2 * cand * wo * cout_p * 2                   # double-buffered bf16 output
        acc_b = 2 * cand * wc * cout_p * 4                   # f32 accumulator + dot temp
        tap_b = cand * wc * cin_p * 2                        # materialized tap slice
        wts_b = 2 * n_taps * cin_p * cout_p * 2
        if x_in + x_hal + scr + out_b + acc_b + tap_b + wts_b <= _VMEM_BUDGET:
            return cand
    return 8


# ----------------------------------------------------------------------------
# Pallas kernel 1: fused "tap" convolution.
#   bias + ReLU + MaxPool(1,pool) + InstanceNorm statistics fused in the epilogue.
# ----------------------------------------------------------------------------
def _make_conv_kernel(*, taps, wc, wo, pool, relu, with_stats, halo, hb, h_real, tr):
    def kernel(*refs):
        i = 0
        x_ref = refs[i]; i += 1
        xh_ref = None
        if halo:
            xh_ref = refs[i]; i += 1
        w_ref = refs[i]; i += 1
        b_ref = refs[i]; i += 1
        o_ref = refs[i]; i += 1
        st_ref = None
        if with_stats:
            st_ref = refs[i]; i += 1
        xwin_ref = refs[i] if halo else None

        cout = o_ref.shape[-1]

        if halo:
            # Assemble the (tr + hb)-row time-haloed window once; taps slice it below.
            xwin_ref[0:tr, :, :] = x_ref[...]
            xwin_ref[tr:tr + hb, :, :] = xh_ref[...]
            src = xwin_ref
        else:
            src = x_ref

        # One (tr*wc, Cin) x (Cin, Cout) MXU matmul per static tap; value-chain
        # accumulation (no per-row loop, no explicit accumulator RMW in the body).
        acc = None
        for ti, (toff, foff) in enumerate(taps):
            xw = src[toff:toff + tr, foff:foff + wc, :]          # (tr, wc, Cin) bf16
            lhs = xw.reshape(tr * wc, xw.shape[-1])
            d = jnp.dot(lhs, w_ref[ti], preferred_element_type=jnp.float32)
            acc = d if acc is None else acc + d

        y = acc + b_ref[...]                                      # bias added once / tile
        if relu:
            y = jnp.maximum(y, 0.0)
        if pool is not None and pool > 1:
            # MaxPool over `pool` consecutive freq bins (groups never straddle rows).
            y = jnp.max(y.reshape((tr * wc) // pool, pool, cout), axis=1)
        y = y.reshape(tr, wo, cout)
        o_ref[...] = y.astype(o_ref.dtype)                        # single lane-dense store

        if with_stats:
            ht = pl.program_id(1)
            t_idx = jax.lax.broadcasted_iota(jnp.int32, (tr, 1, 1), 0)
            ym = jnp.where((t_idx + ht * tr) < h_real, y, 0.0).reshape(tr * wo, cout)
            st_ref[0:1, :] = jnp.sum(ym, axis=0, keepdims=True)
            st_ref[1:2, :] = jnp.sum(ym * ym, axis=0, keepdims=True)

    return kernel


# ----------------------------------------------------------------------------
# Pallas kernel 2: whole-tile InstanceNorm apply.
# ----------------------------------------------------------------------------
def _in_norm_kernel(x_ref, mr_ref, o_ref):
    # x_ref: (tr, Wo, C) bf16; mr_ref: (2, C) f32 = [mean; rstd]
    x = x_ref[...].astype(jnp.float32)
    mean = mr_ref[0:1, :]
    rstd = mr_ref[1:2, :]
    o_ref[...] = ((x - mean) * rstd).astype(o_ref.dtype)


# ----------------------------------------------------------------------------
# Fused conv('same') [+ReLU] [+MaxPool(1,pool)] [+InstanceNorm2d] block.
# ----------------------------------------------------------------------------
@functools.partial(
    jax.jit,
    static_argnames=("taps", "halo", "pw", "relu", "pool", "apply_in"))
def _block_jit(x, w_taps, bias, *, taps, halo, pw, relu, pool, apply_in):
    """x: (B, H, W, Cin) NHWC, w_taps: (T, Cin, Cout), bias: (Cout,).
    Returns (B, H, W_out, Cout) bf16."""
    B, H, W, Cin = x.shape
    T, _, Cout = w_taps.shape
    wc = W                                             # 'same' conv keeps the freq width
    wo = wc // pool if (pool is not None and pool > 1) else wc
    wp = W + 2 * pw
    hb = _HB if halo > 0 else 0
    ph_t = halo // 2                                   # symmetric 'same' time padding

    tr = _pick_tr(wp, wc, wo, Cin, Cout, halo, T)
    if halo > 0:
        tr = min(tr, _round_up(H, hb))                 # keep tr a multiple of hb
    else:
        tr = min(tr, H)
    n_ht = -(-H // tr)
    hpad = n_ht * tr
    xp_len = hpad + (tr if halo > 0 else 0)            # room for the halo fetch blocks

    # Only small spatial halo pads + tile rounding; no kh-times channel concat in HBM.
    xp = jnp.pad(x.astype(jnp.bfloat16),
                 ((0, 0), (ph_t, xp_len - ph_t - H), (pw, pw), (0, 0)))

    kernel = _make_conv_kernel(taps=taps, wc=wc, wo=wo, pool=pool, relu=relu,
                               with_stats=apply_in, halo=halo, hb=hb,
                               h_real=H, tr=tr)

    in_specs = [pl.BlockSpec((None, tr, wp, Cin), lambda b, h: (b, h, 0, 0))]
    operands = [xp]
    if halo > 0:
        step = tr // hb
        in_specs.append(
            pl.BlockSpec((None, hb, wp, Cin), lambda b, h: (b, (h + 1) * step, 0, 0)))
        operands.append(xp)
    in_specs += [pl.BlockSpec((T, Cin, Cout), lambda b, h: (0, 0, 0)),
                 pl.BlockSpec((1, Cout), lambda b, h: (0, 0))]
    operands += [w_taps.astype(jnp.bfloat16),
                 bias.reshape(1, Cout).astype(jnp.float32)]

    o_spec = pl.BlockSpec((None, tr, wo, Cout), lambda b, h: (b, h, 0, 0))
    o_shape = jax.ShapeDtypeStruct((B, hpad, wo, Cout), jnp.bfloat16)
    if apply_in:
        out_specs = (o_spec,
                     pl.BlockSpec((None, None, 2, Cout), lambda b, h: (b, h, 0, 0)))
        out_shape = (o_shape,
                     jax.ShapeDtypeStruct((B, n_ht, 2, Cout), jnp.float32))
    else:
        out_specs = o_spec
        out_shape = o_shape

    scratch = ([pltpu.VMEM((tr + hb, wp, Cin), jnp.bfloat16)] if halo > 0 else [])

    cparams = pltpu.CompilerParams(
        dimension_semantics=("parallel", "parallel"),
        vmem_limit_bytes=_VMEM_LIMIT)

    res = pl.pallas_call(
        kernel,
        out_shape=out_shape,
        grid=(B, n_ht),
        in_specs=in_specs,
        out_specs=out_specs,
        scratch_shapes=scratch,
        compiler_params=cparams,
    )(*operands)

    if not apply_in:
        return res[:, :H]

    y_pad, pstats = res
    # Finalize InstanceNorm stats (tiny reduction in JAX) and apply tiled normalize.
    s = jnp.sum(pstats, axis=1)                        # (B, 2, Cout)
    n = jnp.float32(H * wo)
    mean = s[:, 0] / n
    var = jnp.maximum(s[:, 1] / n - mean * mean, 0.0)  # biased var (PyTorch IN)
    rstd = jax.lax.rsqrt(var + 1e-5)
    mr = jnp.stack([mean, rstd], axis=1)               # (B, 2, Cout) f32

    y = pl.pallas_call(
        _in_norm_kernel,
        out_shape=jax.ShapeDtypeStruct((B, hpad, wo, Cout), jnp.bfloat16),
        grid=(B, n_ht),
        in_specs=[pl.BlockSpec((None, tr, wo, Cout), lambda b, h: (b, h, 0, 0)),
                  pl.BlockSpec((None, 2, Cout), lambda b, h: (b, 0, 0))],
        out_specs=pl.BlockSpec((None, tr, wo, Cout), lambda b, h: (b, h, 0, 0)),
        compiler_params=cparams,
    )(y_pad, mr)
    return y[:, :H]


def conv_in_block(x, prm, dilation=(1, 1), pool=None):
    """Conv2d('same') + ReLU [+ MaxPool2d([1,pool])] + InstanceNorm2d, NHWC=(B,T,F,C)."""
    w, b = prm
    cout, cin, kh, kw = w.shape
    dh, dw = int(dilation[0]), int(dilation[1])
    # w_taps[i*kw + j, c, o] = W[o, c, i, j]
    w_taps = jnp.transpose(w, (2, 3, 1, 0)).reshape(kh * kw, cin, cout)
    taps = tuple((i * dh, j * dw) for i in range(kh) for j in range(kw))
    halo = dh * (kh - 1)
    pw = dw * (kw - 1) // 2
    return _block_jit(x, w_taps, b, taps=taps, halo=halo, pw=pw,
                      relu=True, pool=pool, apply_in=True)


def harmonic_block(x, convs, dils):
    # TODO(synk): HarmonicDilatedConv definition not in the snippet; HPPNet-style
    # sum of eight [1,3] convs with harmonic dilations followed by one ReLU is used.
    cout, cin = convs[0][0].shape[0], convs[0][0].shape[1]
    pw = max(dils)
    w_taps = jnp.concatenate(
        [jnp.transpose(w, (2, 3, 1, 0)).reshape(3, cin, cout) for (w, _) in convs],
        axis=0)                                        # (8*3, Cin, Cout)
    bias = sum(b for (_, b) in convs)
    taps = tuple((0, pw + (j - 1) * d) for d in dils for j in range(3))
    # TODO(synk): opt #11 (ragged per-dilation freq ranges instead of pad-to-max(dils))
    # left unimplemented; shared symmetric pad kept for simplicity.
    return _block_jit(x, w_taps, bias, taps=taps, halo=0, pw=pw,
                      relu=True, pool=None, apply_in=False)


# ----------------------------------------------------------------------------
# PAR_v2_HPP forward (acoustic model).
# ----------------------------------------------------------------------------
def par_v2_hpp_forward(p, spec):
    # spec: (B, 3, F, T) (PyTorch NCHW).  Torch forward starts with
    # mel.permute(0,1,3,2) -> NCHW (B,3,T,F); carried here as NHWC (B,T,F,3).
    x = jnp.transpose(spec, (0, 3, 2, 1))
    npp = p['n_per_pitch']
    x = conv_in_block(x, p['block_1'])
    x = conv_in_block(x, p['block_2'])
    x = conv_in_block(x, p['block_2_5'])
    x = harmonic_block(x, p['conv_3'], p['dils'])
    x = harmonic_block(x, p['conv_4'], p['dils'])
    x = harmonic_block(x, p['conv_5'], p['dils'])
    x = conv_in_block(x, p['block_4'], dilation=(1, 12 * npp), pool=npp)
    x = x[:, :, :88, :]                                # NCHW x[:, :, :, :88]
    x = conv_in_block(x, p['block_5'], dilation=(1, 12))
    x = conv_in_block(x, p['block_6'])
    x = conv_in_block(x, p['block_7'])
    x = conv_in_block(x, p['block_8'])
    # NHWC (B,T,88,C) -> (B,T,C,88)  (== torch permute(0,2,1,3) on the NCHW result)
    return jnp.transpose(x.astype(jnp.float32), (0, 1, 3, 2))


# ----------------------------------------------------------------------------
# MIDIFrontEnd stand-in.
# ----------------------------------------------------------------------------
@jax.jit
def _frontend_jit(audio, fb):
    # TODO(synk): MIDIFrontEnd definition not in the snippet; shape-faithful
    # deterministic stand-in: framed audio x 3 filterbanks + log magnitude.
    B, L = audio.shape
    T = (L - 1) // HOP + 1
    pad = N_FFT // 2
    ap = jnp.pad(audio, ((0, 0), (pad, pad)))
    idx = jnp.arange(T)[:, None] * HOP + jnp.arange(N_FFT)[None, :]
    frames = ap[:, idx]                                # (B, T, N_FFT)
    nf = fb.shape[1]
    y = _block_jit(frames[:, None], fb[None], jnp.zeros((nf,), jnp.float32),
                   taps=((0, 0),), halo=0, pw=0,
                   relu=False, pool=None, apply_in=False)
    y = y[:, 0].astype(jnp.float32)                    # (B, T, nf)
    spec = jnp.log(jnp.maximum(jnp.abs(y), 1e-7))
    F = nf // 3
    return jnp.transpose(spec.reshape(B, T, 3, F), (0, 2, 3, 1))   # (B, 3, F, T)


def midi_frontend(fb, audio):
    return _frontend_jit(audio, fb)


# ----------------------------------------------------------------------------
# ARModel forward (use_vel=False).
# ----------------------------------------------------------------------------
def local_forward(params, audio, unpad_start=False, unpad_end=False):
    spec = midi_frontend(params['frontend_fb'], audio)
    if unpad_start:
        spec = spec[:, :, :, N_FFT // 2 // HOP:]
    if unpad_end:
        spec = spec[:, :, :, :-N_FFT // 2 // HOP]
    return par_v2_hpp_forward(params, spec)


def ar_forward(params, audio, max_step=400):
    batch_size, audio_len = audio.shape
    step_len = (audio_len - 1) // HOP + 1
    n_segs = (step_len - 1) // max_step + 1
    if 0 <= audio_len - (n_segs - 1) * max_step * HOP < N_FFT // 2:
        n_segs -= 1
    seg_edges = [el * max_step for el in range(n_segs)]

    frame = jnp.zeros((batch_size, step_len, 128, 88), jnp.float32)
    for step in seg_edges:
        offset = step
        if step == 0:
            unpad_start, start = False, 0
        else:
            unpad_start, start = True, offset * HOP - N_FFT // 2
        if step == seg_edges[-1]:
            unpad_end, end = False, audio_len
        else:
            unpad_end = True
            end = (offset + max_step + 10) * HOP + N_FFT // 2

        conv_out = local_forward(params, audio[:, start:end],
                                 unpad_start=unpad_start, unpad_end=unpad_end)
        if step == seg_edges[-1]:
            frame = frame.at[:, offset:].set(conv_out)
        else:
            frame = frame.at[:, offset:offset + max_step].set(conv_out[:, :max_step])
    return frame


# ----------------------------------------------------------------------------
# Deterministic parameter initialization (shapes from PAR_v2_HPP(48, 48, 5)).
# ----------------------------------------------------------------------------
def init_params(key, cnn_unit=48, n_per_pitch=5):
    keys = iter(jax.random.split(key, 128))

    def conv(cin, cout, kh, kw):
        fan = cin * kh * kw
        w = jax.random.normal(next(keys), (cout, cin, kh, kw), jnp.float32) / math.sqrt(fan)
        b = jax.random.normal(next(keys), (cout,), jnp.float32) * 0.01
        return (w, b)

    c3 = 128
    dils = [round(12 * n_per_pitch * math.log2(a)) for a in range(2, 10)]
    p = {
        'n_per_pitch': n_per_pitch,
        'dils': dils,
        'frontend_fb': jax.random.normal(
            next(keys), (N_FFT, 3 * N_PITCH * n_per_pitch), jnp.float32) * 0.05,
        'block_1': conv(3, cnn_unit, 7, 7),
        'block_2': conv(cnn_unit, cnn_unit, 7, 7),
        'block_2_5': conv(cnn_unit, cnn_unit, 7, 7),
        'conv_3': [conv(cnn_unit, c3, 1, 3) for _ in dils],
        'conv_4': [conv(c3, c3, 1, 3) for _ in dils],
        'conv_5': [conv(c3, c3, 1, 3) for _ in dils],
        'block_4': conv(c3, c3, 1, 3),
        'block_5': conv(c3, c3, 1, 3),
        'block_6': conv(c3, c3, 5, 1),
        'block_7': conv(c3, c3, 5, 1),
        'block_8': conv(c3, c3, 5, 1),
    }
    return p


if __name__ == "__main__":
    key = jax.random.PRNGKey(0)
    pkey, akey = jax.random.split(key)
    params = init_params(pkey, cnn_unit=48, n_per_pitch=5)

    batch, audio_len = 1, 2000          # step_len = (2000-1)//160 + 1 = 13 frames
    audio = jax.random.normal(akey, (batch, audio_len), jnp.float32) * 0.1

    out = ar_forward(params, audio, max_step=400)
    out = jax.block_until_ready(out)

    expected_step_len = (audio_len - 1) // HOP + 1
    assert out.shape == (batch, expected_step_len, 128, 88), out.shape
    assert bool(jnp.all(jnp.isfinite(out)))
    print("KERNEL_OK")
</pallas_src>

<mosaic_0001>
module attributes {stable_mosaic.version = 11 : i64} {
  func.func @kernel(%arg0: i32, %arg1: i32, %arg2: memref<1x1x13x495xbf16, #tpu.memory_space<vmem>>, %arg3: memref<1x495x1320xbf16, #tpu.memory_space<vmem>>, %arg4: memref<1x1320xf32, #tpu.memory_space<vmem>>, %arg5: memref<1x1x13x1320xbf16, #tpu.memory_space<vmem>>) attributes {dimension_semantics = [#tpu.dimension_semantics<parallel>, #tpu.dimension_semantics<parallel>], iteration_bounds = array<i64: 1, 1>, scalar_prefetch = 0 : i64, scratch_operands = 0 : i64, tpu.core_type = #tpu.core_type<tc>, window_params = [{transform_indices = @transform_0, window_bounds = array<i64: 1, 1, 13, 495>}, {pipeline_mode = #tpu.pipeline_mode<synchronous>, transform_indices = @transform_1, window_bounds = array<i64: 1, 495, 1320>}, {pipeline_mode = #tpu.pipeline_mode<synchronous>, transform_indices = @transform_2, window_bounds = array<i64: 1, 1320>}, {transform_indices = @transform_3, window_bounds = array<i64: 1, 1, 13, 1320>}]} {
    %c0 = arith.constant 0 : index
    %c0_0 = arith.constant 0 : index
    %c0_1 = arith.constant 0 : index
    %c0_2 = arith.constant 0 : index
    %0 = vector.load %arg2[%c0, %c0_0, %c0_1, %c0_2] : memref<1x1x13x495xbf16, #tpu.memory_space<vmem>>, vector<1x1x13x495xbf16>
    %1 = vector.shape_cast %0 : vector<1x1x13x495xbf16> to vector<1x13x495xbf16>
    %2 = vector.shape_cast %1 : vector<1x13x495xbf16> to vector<13x495xbf16>
    %c0_3 = arith.constant 0 : index
    %c0_4 = arith.constant 0 : index
    %c0_5 = arith.constant 0 : index
    %3 = vector.load %arg3[%c0_3, %c0_4, %c0_5] : memref<1x495x1320xbf16, #tpu.memory_space<vmem>>, vector<1x495x1320xbf16>
    %4 = vector.shape_cast %3 : vector<1x495x1320xbf16> to vector<495x1320xbf16>
    %cst = arith.constant dense<0.000000e+00> : vector<13x1320xf32>
    %5 = tpu.matmul %2, %4, %cst {dimension_numbers = #tpu.dot_dimension_numbers<[1], [0], [0], [1], [0, 0, 1, 1], [], []>} : vector<13x495xbf16>, vector<495x1320xbf16>, vector<13x1320xf32> -> vector<13x1320xf32>
    %c0_6 = arith.constant 0 : index
    %c0_7 = arith.constant 0 : index
    %6 = vector.load %arg4[%c0_6, %c0_7] : memref<1x1320xf32, #tpu.memory_space<vmem>>, vector<1x1320xf32>
    %7 = vector.broadcast %6 : vector<1x1320xf32> to vector<13x1320xf32>
    %8 = arith.addf %5, %7 : vector<13x1320xf32>
    %9 = vector.shape_cast %8 : vector<13x1320xf32> to vector<1x13x1320xf32>
    %10 = arith.truncf %9 : vector<1x13x1320xf32> to vector<1x13x1320xbf16>
    %c0_8 = arith.constant 0 : index
    %c0_9 = arith.constant 0 : index
    %c0_10 = arith.constant 0 : index
    %c0_11 = arith.constant 0 : index
    %11 = vector.load %arg5[%c0_8, %c0_9, %c0_10, %c0_11] : memref<1x1x13x1320xbf16, #tpu.memory_space<vmem>>, vector<1x1x13x1320xbf16>
    %12 = vector.shape_cast %11 : vector<1x1x13x1320xbf16> to vector<1x13x1320xbf16>
    %13 = vector.shape_cast %10 : vector<1x13x1320xbf16> to vector<1x1x13x1320xbf16>
    tpu.vector_store %arg5[%c0_8, %c0_9, %c0_10, %c0_11], %13 {strides = array<i32>} : memref<1x1x13x1320xbf16, #tpu.memory_space<vmem>>, vector<1x1x13x1320xbf16>,
    return
  }
  func.func @transform_0(%arg0: i32, %arg1: i32) -> (i32, i32, i32, i32) {
    %c0_i32 = arith.constant 0 : i32
    %c0_i32_0 = arith.constant 0 : i32
    %c0_i32_1 = arith.constant 0 : i32
    return %arg0, %arg1, %c0_i32, %c0_i32_0 : i32, i32, i32, i32
  }
  func.func @transform_1(%arg0: i32, %arg1: i32) -> (i32, i32, i32) {
    %c0_i32 = arith.constant 0 : i32
    %c0_i32_0 = arith.constant 0 : i32
    %c0_i32_1 = arith.constant 0 : i32
    %c0_i32_2 = arith.constant 0 : i32
    return %c0_i32, %c0_i32_0, %c0_i32_1 : i32, i32, i32
  }
  func.func @transform_2(%arg0: i32, %arg1: i32) -> (i32, i32) {
    %c0_i32 = arith.constant 0 : i32
    %c0_i32_0 = arith.constant 0 : i32
    %c0_i32_1 = arith.constant 0 : i32
    return %c0_i32, %c0_i32_0 : i32, i32
  }
  func.func @transform_3(%arg0: i32, %arg1: i32) -> (i32, i32, i32, i32) {
    %c0_i32 = arith.constant 0 : i32
    %c0_i32_0 = arith.constant 0 : i32
    %c0_i32_1 = arith.constant 0 : i32
    return %arg0, %arg1, %c0_i32, %c0_i32_0 : i32, i32, i32, i32
  }
}

</mosaic_0001>

<bundles_post_ra>
// kernel: _block_jit.1
= control target key start
LH: loop header
LB: loop body
LE: loop exit
PB: predicated region body
PF: predicated region fallthrough
CT: control target
= control target key end

     0   :  { %vm2166_vm0 = vcmask 1046528   ;;  %vm2167_vm1 = vcmask 1047552   ;;  %v4650_v14 = vmov 65535   ;;  %vm2162_vm2 = vcmask 908288   ;;  %s6961_s0 = inlined_call_operand.vmem [shape: bf16[1,1,13,495], index: 0, kind: input, shape index: {}]   ;;  %s6962_s1 = inlined_call_operand.vmem [shape: bf16[1,495,1320], index: 1, kind: input, shape index: {}]   ;;  %s6963_s2 = inlined_call_operand.vmem [shape: f32[1,1320], index: 2, kind: input, shape index: {}]   ;;  %s6964_s3 = inlined_call_operand.hbm [shape: bf16[1,1,13,1320], index: 3, kind: output, shape index: {}]  }
   0x1   :  { %v3209_v0 = vld [vmem:[%s6962_s1 + $0x268] sm:$0xf]  ;;  %v4360_v1 = vld [vmem:[%s6962_s1 + $0x290] sm:$0xf0]  ;;  %v4221_v5 = vld [vmem:[%s6962_s1 + $0xa50] sm:$0xf] }
   0x2   :  { %v3913_v2 = vld [vmem:[%s6962_s1 + $0x7e8] sm:$0xf]  ;;  %v3210_v3 = vor.u32 %v4360_v1, %v3209_v0  ;;  %v4536_v4 = vld [vmem:[%s6962_s1 + $0x810] sm:$0xf0]  ;;  %v4613_v6 = vld [vmem:[%s6962_s1 + $0xa78] sm:$0xf0] }
   0x3   :  { %v3914_v7 = vor.u32 %v4536_v4, %v3913_v2  ;;  %v4222_v8 = vor.u32 %v4613_v6, %v4221_v5  ;;  %v3165_v9 = vld [vmem:[%s6962_s1 + $0x210] sm:$0xf]  ;;  %v4349_v10 = vld [vmem:[%s6962_s1 + $0x238] sm:$0xf0]  ;;  %v3561_v12 = vld [vmem:[%s6962_s1 + $0x528] sm:$0xf] }
   0x4   :  { %2203 = vmatpush.bf16.msra.mxu0 %v3210_v3  ;;  %v3166_v11 = vor.u32 %v4349_v10, %v3165_v9  ;;  %v4448_v13 = vld [vmem:[%s6962_s1 + $0x550] sm:$0xf0]  ;;  %v2168_v15 = vsel %vm2166_vm0, 4294967295, %v4650_v14  ;;  %v3869_v17 = vld [vmem:[%s6962_s1 + $0x790] sm:$0xf] }
   0x5   :  { %2231 = vmatpush.bf16.msra.mxu2 %v3914_v7  ;;  %v3562_v16 = vor.u32 %v4448_v13, %v3561_v12  ;;  %v4525_v18 = vld [vmem:[%s6962_s1 + $0x7b8] sm:$0xf0]  ;;  %v4710_v19 = vsel %vm2167_vm1, %v2168_v15, 0  ;;  %v4177_v21 = vld [vmem:[%s6962_s1 + $0x9f8] sm:$0xf] }
   0x6   :  { %v3870_v20 = vor.u32 %v4525_v18, %v3869_v17  ;;  %v4602_v22 = vld [vmem:[%s6962_s1 + $0xa20] sm:$0xf0]  ;;  %v2171_v23 = vand.u32 %v4222_v8, %v4710_v19  ;;  %v3121_v24 = vld [vmem:[%s6962_s1 + $0x1b8] sm:$0xf]  ;;  %v3517_v26 = vld [vmem:[%s6962_s1 + $0x4d0] sm:$0xf] }
   0x7   :  { %2217 = vmatpush.bf16.msra.mxu1 %v3562_v16  ;;  %v4338_v25 = vld [vmem:[%s6962_s1 + $0x1e0] sm:$0xf0]  ;;  %v4437_v28 = vld [vmem:[%s6962_s1 + $0x4f8] sm:$0xf0]  ;;  %v3825_v29 = vld [vmem:[%s6962_s1 + $0x738] sm:$0xf]  ;;  %v4178_v31 = vor.u32 %v4602_v22, %v4177_v21 }
   0x8   :  { %2204 = vmatpush.bf16.msra.mxu0 %v3166_v11  ;;  %v3122_v27 = vor.u32 %v4338_v25, %v3121_v24  ;;  %v4514_v30 = vld [vmem:[%s6962_s1 + $0x760] sm:$0xf0]  ;;  %2246 = vmatpush.bf16.msra.mxu3 %v2171_v23  ;;  %v3518_v32 = vor.u32 %v4437_v28, %v3517_v26  ;;  %v4133_v34 = vld [vmem:[%s6962_s1 + $0x9a0] sm:$0xf]  ;;  %v4591_v35 = vld [vmem:[%s6962_s1 + $0x9c8] sm:$0xf0] }
   0x9   :  { %2232 = vmatpush.bf16.msra.mxu2 %v3870_v20  ;;  %v3826_v33 = vor.u32 %v4514_v30, %v3825_v29  ;;  %v3077_v36 = vld [vmem:[%s6962_s1 + $0x160] sm:$0xf]  ;;  %v4327_v37 = vld [vmem:[%s6962_s1 + $0x188] sm:$0xf0]  ;;  %v3473_v38 = vld [vmem:[%s6962_s1 + $0x478] sm:$0xf]  ;;  %v4134_v46 = vor.u32 %v4591_v35, %v4133_v34 }
   0xa   :  { %v4426_v39 = vld [vmem:[%s6962_s1 + $0x4a0] sm:$0xf0]  ;;  %v3781_v41 = vld [vmem:[%s6962_s1 + $0x6e0] sm:$0xf]  ;;  %v4503_v42 = vld [vmem:[%s6962_s1 + $0x708] sm:$0xf0]  ;;  %v3078_v43 = vor.u32 %v4327_v37, %v3077_v36 }
   0xb   :  { %2218 = vmatpush.bf16.msra.mxu1 %v3518_v32  ;;  %v3474_v40 = vor.u32 %v4426_v39, %v3473_v38  ;;  %v4089_v44 = vld [vmem:[%s6962_s1 + $0x948] sm:$0xf]  ;;  %v3782_v47 = vor.u32 %v4503_v42, %v3781_v41  ;;  %v4316_v48 = vld [vmem:[%s6962_s1 + $0x130] sm:$0xf0]  ;;  %v3429_v49 = vld [vmem:[%s6962_s1 + $0x420] sm:$0xf] }
   0xc   :  { %2205 = vmatpush.bf16.msra.mxu0 %v3122_v27  ;;  %v3033_v45 = vld [vmem:[%s6962_s1 + $0x108] sm:$0xf]  ;;  %2247 = vmatpush.bf16.msra.mxu3 %v4178_v31  ;;  %v4415_v50 = vld [vmem:[%s6962_s1 + $0x448] sm:$0xf0]  ;;  %v4580_v51 = vld [vmem:[%s6962_s1 + $0x970] sm:$0xf0] }
   0xd   :  { %2233 = vmatpush.bf16.msra.mxu2 %v3826_v33  ;;  %v3737_v52 = vld [vmem:[%s6962_s1 + $0x688] sm:$0xf]  ;;  %v4492_v53 = vld [vmem:[%s6962_s1 + $0x6b0] sm:$0xf0]  ;;  %v3430_v54 = vor.u32 %v4415_v50, %v3429_v49  ;;  %v3034_v55 = vor.u32 %v4316_v48, %v3033_v45  ;;  %v4090_v58 = vor.u32 %v4580_v51, %v4089_v44  ;;  %v4045_v60 = vld [vmem:[%s6962_s1 + $0x8f0] sm:$0xf] }
   0xe   :  { %v3385_v56 = vld [vmem:[%s6962_s1 + $0x3c8] sm:$0xf]  ;;  %v4404_v57 = vld [vmem:[%s6962_s1 + $0x3f0] sm:$0xf0]  ;;  %v3738_v59 = vor.u32 %v4492_v53, %v3737_v52  ;;  %v2989_v61 = vld [vmem:[%s6962_s1 + $0xb0] sm:$0xf] }
   0xf   :  { %2219 = vmatpush.bf16.msra.mxu1 %v3474_v40  ;;  %v4305_v62 = vld [vmem:[%s6962_s1 + $0xd8] sm:$0xf0]  ;;  %v3693_v0 = vld [vmem:[%s6962_s1 + $0x630] sm:$0xf]  ;;  %v3386_v2 = vor.u32 %v4404_v57, %v3385_v56  ;;  %v4001_v8 = vld [vmem:[%s6962_s1 + $0x898] sm:$0xf] }
  0x10   :  { %2206 = vmatpush.bf16.msra.mxu0 %v3078_v43  ;;  %2248 = vmatpush.bf16.msra.mxu3 %v4134_v46  ;;  %v4569_v63 = vld [vmem:[%s6962_s1 + $0x918] sm:$0xf0]  ;;  %v2990_v3 = vor.u32 %v4305_v62, %v2989_v61  ;;  %v3341_v4 = vld [vmem:[%s6962_s1 + $0x370] sm:$0xf]  ;;  %v2945_v9 = vld [vmem:[%s6962_s1 + $0x58] sm:$0xf] }
  0x11   :  { %2234 = vmatpush.bf16.msra.mxu2 %v3782_v47  ;;  %v4481_v1 = vld [vmem:[%s6962_s1 + $0x658] sm:$0xf0]  ;;  %v4046_v6 = vor.u32 %v4569_v63, %v4045_v60  ;;  %v4294_v10 = vld [vmem:[%s6962_s1 + $0x80] sm:$0xf0]  ;;  %v3649_v12 = vld [vmem:[%s6962_s1 + $0x5d8] sm:$0xf] }
  0x12   :  { %v4393_v5 = vld [vmem:[%s6962_s1 + $0x398] sm:$0xf0]  ;;  %v3694_v7 = vor.u32 %v4481_v1, %v3693_v0  ;;  %v4558_v11 = vld [vmem:[%s6962_s1 + $0x8c0] sm:$0xf0]  ;;  %v3297_v15 = vld [vmem:[%s6962_s1 + $0x318] sm:$0xf]  ;;  %v2946_v16 = vor.u32 %v4294_v10, %v2945_v9 }
  0x13   :  { %2220 = vmatpush.bf16.msra.mxu1 %v3430_v54  ;;  %v4470_v13 = vld [vmem:[%s6962_s1 + $0x600] sm:$0xf0]  ;;  %v3342_v14 = vor.u32 %v4393_v5, %v3341_v4  ;;  %v3957_v17 = vld [vmem:[%s6962_s1 + $0x840] sm:$0xf]  ;;  %v4608_v20 = vld [vmem:[%s6962_s1 + $0xa54] sm:$0xf]  ;;  %v4002_v22 = vor.u32 %v4558_v11, %v4001_v8 }
  0x14   :  { %2207 = vmatpush.bf16.msra.mxu0 %v3034_v55  ;;  %2249 = vmatpush.bf16.msra.mxu3 %v4090_v58  ;;  %v4382_v18 = vld [vmem:[%s6962_s1 + $0x340] sm:$0xf0]  ;;  %v4223_v21 = vld [vmem:[%s6962_s1 + $0xa7c] sm:$0xf0]  ;;  %v3650_v23 = vor.u32 %v4470_v13, %v3649_v12  ;;  %v4547_v24 = vld [vmem:[%s6962_s1 + $0x868] sm:$0xf0] }
  0x15   :  { %2235 = vmatpush.bf16.msra.mxu2 %v3738_v59  ;;  %v2901_v25 = vld [vmem:[%s6962_s1] sm:$0xf]  ;;  %v4283_v26 = vld [vmem:[%s6962_s1 + $0x28] sm:$0xf0]  ;;  %v3211_v30 = vld [vmem:[%s6962_s1 + $0x294] sm:$0xf0]  ;;  %v3298_v31 = vor.u32 %v4382_v18, %v3297_v15  ;;  %v4226_v34 = vor.u32 %v4608_v20, %v4223_v21  ;;  %v3958_v38 = vor.u32 %v4547_v24, %v3957_v17 }
  0x16   :  { %v4355_v27 = vld [vmem:[%s6962_s1 + $0x26c] sm:$0xf]  ;;  %v3605_v28 = vld [vmem:[%s6962_s1 + $0x580] sm:$0xf]  ;;  %v3563_v33 = vld [vmem:[%s6962_s1 + $0x554] sm:$0xf0]  ;;  %v2902_v35 = vor.u32 %v4283_v26, %v2901_v25 }
  0x17   :  { %2221 = vmatpush.bf16.msra.mxu1 %v3386_v2  ;;  %v4459_v29 = vld [vmem:[%s6962_s1 + $0x5a8] sm:$0xf0]  ;;  %v3253_v36 = vld [vmem:[%s6962_s1 + $0x2c0] sm:$0xf]  ;;  %v3915_v41 = vld [vmem:[%s6962_s1 + $0x814] sm:$0xf0]  ;;  %v3214_v42 = vor.u32 %v4355_v27, %v3211_v30  ;;  %v2174_v46 = vand.u32 %v4226_v34, %v4710_v19 }
  0x18   :  { %2208 = vmatpush.bf16.msra.mxu0 %v2990_v3  ;;  %2250 = vmatpush.bf16.msra.mxu3 %v4046_v6  ;;  %v4443_v32 = vld [vmem:[%s6962_s1 + $0x52c] sm:$0xf]  ;;  %v3606_v39 = vor.u32 %v4459_v29, %v3605_v28  ;;  %v4344_v44 = vld [vmem:[%s6962_s1 + $0x214] sm:$0xf]  ;;  %v3167_v45 = vld [vmem:[%s6962_s1 + $0x23c] sm:$0xf0] }
  0x19   :  { %2236 = vmatpush.bf16.msra.mxu2 %v3694_v7  ;;  %v4371_v37 = vld [vmem:[%s6962_s1 + $0x2e8] sm:$0xf0]  ;;  %v3566_v43 = vor.u32 %v4443_v32, %v3563_v33  ;;  %v4432_v48 = vld [vmem:[%s6962_s1 + $0x4d4] sm:$0xf]  ;;  %v3519_v49 = vld [vmem:[%s6962_s1 + $0x4fc] sm:$0xf0]  ;;  %v3170_v57 = vor.u32 %v4344_v44, %v3167_v45 }
  0x1a   :  { %v4531_v40 = vld [vmem:[%s6962_s1 + $0x7ec] sm:$0xf]  ;;  %v3254_v47 = vor.u32 %v4371_v37, %v3253_v36  ;;  %v4597_v50 = vld [vmem:[%s6962_s1 + $0x9fc] sm:$0xf]  ;;  %v4179_v52 = vld [vmem:[%s6962_s1 + $0xa24] sm:$0xf0]  ;;  %v3522_v58 = vor.u32 %v4432_v48, %v3519_v49 }
  0x1b   :  { %2222 = vmatpush.bf16.msra.mxu1 %v3342_v14  ;;  %v3918_v51 = vor.u32 %v4531_v40, %v3915_v41  ;;  %v4520_v53 = vld [vmem:[%s6962_s1 + $0x794] sm:$0xf]  ;;  %v3871_v54 = vld [vmem:[%s6962_s1 + $0x7bc] sm:$0xf0]  ;;  %v4275_v55 = vld [vmem:[%s6961_s0 + $0xc] sm:$0xf]  ;;  %v4182_v61 = vor.u32 %v4597_v50, %v4179_v52 }
  0x1c   :  { %2209 = vmatpush.bf16.msra.mxu0 %v2946_v16  ;;  %2251 = vmatpush.bf16.msra.mxu3 %v4002_v22  ;;  %v2895_v56 = vld [vmem:[%s6961_s0 + $0x18] sm:$0x70]  ;;  %v3123_v62 = vld [vmem:[%s6962_s1 + $0x1e4] sm:$0xf0]  ;;  %v3874_v1 = vor.u32 %v4520_v53, %v3871_v54  ;;  %v4586_v2 = vld [vmem:[%s6962_s1 + $0x9a4] sm:$0xf] }
  0x1d   :  { %2237 = vmatpush.bf16.msra.mxu2 %v3650_v23  ;;  %v4333_v59 = vld [vmem:[%s6962_s1 + $0x1bc] sm:$0xf]  ;;  %v4921_v60 = vor.u32 %v4275_v55, %v2895_v56  ;;  %v3475_v0 = vld [vmem:[%s6962_s1 + $0x4a4] sm:$0xf0]  ;;  %v4135_v3 = vld [vmem:[%s6962_s1 + $0x9cc] sm:$0xf0] }
  0x1e   :  { %v4421_v63 = vld [vmem:[%s6962_s1 + $0x47c] sm:$0xf]  ;;  %v2893_v4 = vld [vmem:[%s6961_s0 + $0x8] sm:$0xf]  ;;  %v4277_v7 = vld [vmem:[%s6961_s0 + $0x14] sm:$0x70]  ;;  %v3126_v8 = vor.u32 %v4333_v59, %v3123_v62  ;;  %v4138_v14 = vor.u32 %v4586_v2, %v4135_v3 }
  0x1f   :  { %2223 = vmatpush.bf16.msra.mxu1 %v3298_v31  ;;  %v4509_v5 = vld [vmem:[%s6962_s1 + $0x73c] sm:$0xf]  ;;  %v3827_v6 = vld [vmem:[%s6962_s1 + $0x764] sm:$0xf0]  ;;  %v3478_v9 = vor.u32 %v4421_v63, %v3475_v0  ;;  %v4322_v10 = vld [vmem:[%s6962_s1 + $0x164] sm:$0xf]  ;;  %v4955_v11 = vor.u32 %v4277_v7, %v2893_v4 }
  0x20   :  { %2210 = vmatpush.bf16.msra.mxu0 %v2902_v35  ;;  %2252 = vmatpush.bf16.msra.mxu3 %v3958_v38  ;;  %v2885_v12 = vld [vmem:[%s6961_s0] sm:$0xf]  ;;  %v4276_v13 = vld [vmem:[%s6961_s0 + $0xc] sm:$0x70]  ;;  %v4410_v16 = vld [vmem:[%s6962_s1 + $0x424] sm:$0xf]  ;;  %v3830_v20 = vor.u32 %v4509_v5, %v3827_v6 }
  0x21   :  { %2238 = vmatpush.bf16.msra.mxu2 %v3606_v39  ;;  %v3079_v15 = vld [vmem:[%s6962_s1 + $0x18c] sm:$0xf0]  ;;  %v4972_v18 = vor.u32 %v4276_v13, %v2885_v12  ;;  %v4575_v21 = vld [vmem:[%s6962_s1 + $0x94c] sm:$0xf]  ;;  %v4091_v22 = vld [vmem:[%s6962_s1 + $0x974] sm:$0xf0] }
  0x22   :  { %v3431_v17 = vld [vmem:[%s6962_s1 + $0x44c] sm:$0xf0]  ;;  %v4274_v23 = vld [vmem:[%s6961_s0 + $0x4] sm:$0xf]  ;;  %v2887_v26 = vld [vmem:[%s6961_s0 + $0x10] sm:$0x70]  ;;  %v3082_v27 = vor.u32 %v4322_v10, %v3079_v15  ;;  %v4094_v31 = vor.u32 %v4575_v21, %v4091_v22 }
  0x23   :  { %2224 = vmatpush.bf16.msra.mxu1 %v3254_v47  ;;  %4263 = vmatmul.msk.bf16.vlgmr.msra.gmra.mxu3 %vm2162_vm2, %v4921_v60  ;;  %v4498_v24 = vld [vmem:[%s6962_s1 + $0x6e4] sm:$0xf]  ;;  %v3783_v25 = vld [vmem:[%s6962_s1 + $0x70c] sm:$0xf0]  ;;  %v3434_v28 = vor.u32 %v4410_v16, %v3431_v17  ;;  %v4311_v29 = vld [vmem:[%s6962_s1 + $0x10c] sm:$0xf]  ;;  %v4997_v30 = vor.u32 %v4274_v23, %v2887_v26 }
  0x24   :  { %2259 = vmatpush.bf16.msrb.mxu3 %v3214_v42  ;;  %2273 = vmatpush.bf16.msrb.mxu0 %v3566_v43  ;;  %v3035_v32 = vld [vmem:[%s6962_s1 + $0x134] sm:$0xf0]  ;;  %v4399_v33 = vld [vmem:[%s6962_s1 + $0x3cc] sm:$0xf]  ;;  %v3786_v35 = vor.u32 %v4498_v24, %v3783_v25  ;;  %v4564_v36 = vld [vmem:[%s6962_s1 + $0x8f4] sm:$0xf] }
  0x25   :  { %2302 = vmatpush.bf16.msrb.mxu2 %v2174_v46  ;;  %2211 = vmatmul.bf16.vlgmr.msra.gmra.mxu0 %v4972_v18  ;;  %v3387_v34 = vld [vmem:[%s6962_s1 + $0x3f4] sm:$0xf0]  ;;  %v4047_v37 = vld [vmem:[%s6962_s1 + $0x91c] sm:$0xf0]  ;;  %v4487_v38 = vld [vmem:[%s6962_s1 + $0x68c] sm:$0xf]  ;;  %v3038_v40 = vor.u32 %v4311_v29, %v3035_v32 }
  0x26   :  { %2239 = vmatmul.bf16.vlgmr.msra.gmra.mxu2 %v4955_v11  ;;  %v3739_v39 = vld [vmem:[%s6962_s1 + $0x6b4] sm:$0xf0]  ;;  %2225 = vmatmul.bf16.vlgmr.msra.gmra.mxu1 %v4997_v30  ;;  %v3390_v41 = vor.u32 %v4399_v33, %v3387_v34  ;;  %v4300_v42 = vld [vmem:[%s6962_s1 + $0xb4] sm:$0xf]  ;;  %v4050_v43 = vor.u32 %v4564_v36, %v4047_v37  ;;  %v2991_v44 = vld [vmem:[%s6962_s1 + $0xdc] sm:$0xf0] }
  0x27   :  { %2287 = vmatpush.bf16.msrb.mxu1 %v3918_v51  ;;  %v4388_v45 = vld [vmem:[%s6962_s1 + $0x374] sm:$0xf]  ;;  %v3343_v46 = vld [vmem:[%s6962_s1 + $0x39c] sm:$0xf0]  ;;  %v3742_v47 = vor.u32 %v4487_v38, %v3739_v39  ;;  %v4553_v48 = vld [vmem:[%s6962_s1 + $0x89c] sm:$0xf]  ;;  %v2994_v52 = vor.u32 %v4300_v42, %v2991_v44 }
  0x28   :  { %2260 = vmatpush.bf16.msrb.mxu3 %v3170_v57  ;;  %2274 = vmatpush.bf16.msrb.mxu0 %v3522_v58  ;;  %v4003_v49 = vld [vmem:[%s6962_s1 + $0x8c4] sm:$0xf0]  ;;  %v4476_v50 = vld [vmem:[%s6962_s1 + $0x634] sm:$0xf]  ;;  %v3695_v51 = vld [vmem:[%s6962_s1 + $0x65c] sm:$0xf0]  ;;  %v3346_v53 = vor.u32 %v4388_v45, %v3343_v46 }
  0x29   :  { %2303 = vmatpush.bf16.msrb.mxu2 %v4182_v61  ;;  %v4289_v54 = vld [vmem:[%s6962_s1 + $0x5c] sm:$0xf]  ;;  %v2947_v55 = vld [vmem:[%s6962_s1 + $0x84] sm:$0xf0]  ;;  %v4006_v56 = vor.u32 %v4553_v48, %v4003_v49  ;;  %v4542_v59 = vld [vmem:[%s6962_s1 + $0x844] sm:$0xf]  ;;  %v3698_v61 = vor.u32 %v4476_v50, %v3695_v51 }
  0x2a   :  { %v4377_v57 = vld [vmem:[%s6962_s1 + $0x31c] sm:$0xf]  ;;  %v3299_v58 = vld [vmem:[%s6962_s1 + $0x344] sm:$0xf0]  ;;  %v3959_v62 = vld [vmem:[%s6962_s1 + $0x86c] sm:$0xf0]  ;;  %v2950_v5 = vor.u32 %v4289_v54, %v2947_v55 }
  0x2b   :  { %2288 = vmatpush.bf16.msrb.mxu1 %v3874_v1  ;;  %v3217_v63 = vld [vmem:[%s6962_s1 + $0x270] sm:$0xf]  ;;  %v4361_v0 = vld [vmem:[%s6962_s1 + $0x298] sm:$0xf0]  ;;  %v4278_v1 = vld [vmem:[%s6962_s1 + $0x4] sm:$0xf]  ;;  %v3302_v6 = vor.u32 %v4377_v57, %v3299_v58  ;;  %v3962_v10 = vor.u32 %v4542_v59, %v3959_v62 }
  0x2c   :  { %2261 = vmatpush.bf16.msrb.mxu3 %v3126_v8  ;;  %2275 = vmatpush.bf16.msrb.mxu0 %v3478_v9  ;;  %v2903_v2 = vld [vmem:[%s6962_s1 + $0x2c] sm:$0xf0]  ;;  %v4465_v3 = vld [vmem:[%s6962_s1 + $0x5dc] sm:$0xf]  ;;  %v3651_v4 = vld [vmem:[%s6962_s1 + $0x604] sm:$0xf0]  ;;  %v3218_v15 = vor.u32 %v4361_v0, %v3217_v63 }
  0x2d   :  { %2304 = vmatpush.bf16.msrb.mxu2 %v4138_v14  ;;  %v3569_v7 = vld [vmem:[%s6962_s1 + $0x530] sm:$0xf]  ;;  %v4229_v8 = vld [vmem:[%s6962_s1 + $0xa58] sm:$0xf]  ;;  %v4614_v9 = vld [vmem:[%s6962_s1 + $0xa80] sm:$0xf0]  ;;  %v3654_v16 = vor.u32 %v4465_v3, %v3651_v4  ;;  %v2906_v26 = vor.u32 %v4278_v1, %v2903_v2 }
  0x2e   :  { %v4449_v12 = vld [vmem:[%s6962_s1 + $0x558] sm:$0xf0]  ;;  %v4366_v13 = vld [vmem:[%s6962_s1 + $0x2c4] sm:$0xf]  ;;  %v3255_v14 = vld [vmem:[%s6962_s1 + $0x2ec] sm:$0xf0]  ;;  %v4230_v25 = vor.u32 %v4614_v9, %v4229_v8 }
  0x2f   :  { %2289 = vmatpush.bf16.msrb.mxu1 %v3830_v20  ;;  %v3173_v17 = vld [vmem:[%s6962_s1 + $0x218] sm:$0xf]  ;;  %v3921_v20 = vld [vmem:[%s6962_s1 + $0x7f0] sm:$0xf]  ;;  %v4537_v21 = vld [vmem:[%s6962_s1 + $0x818] sm:$0xf0] }
  0x30   :  { %2262 = vmatpush.bf16.msrb.mxu3 %v3082_v27  ;;  %2276 = vmatpush.bf16.msrb.mxu0 %v3434_v28  ;;  %v4350_v22 = vld [vmem:[%s6962_s1 + $0x240] sm:$0xf0]  ;;  %v3607_v24 = vld [vmem:[%s6962_s1 + $0x5ac] sm:$0xf0]  ;;  %v3258_v27 = vor.u32 %v4366_v13, %v3255_v14  ;;  %v3570_v28 = vor.u32 %v4449_v12, %v3569_v7  ;;  %v3922_v29 = vor.u32 %v4537_v21, %v3921_v20  ;;  %v3129_v37 = vld [vmem:[%s6962_s1 + $0x1c0] sm:$0xf] }
  0x31   :  { %2305 = vmatpush.bf16.msrb.mxu2 %v4094_v31  ;;  %v4454_v23 = vld [vmem:[%s6962_s1 + $0x584] sm:$0xf]  ;;  %v3525_v31 = vld [vmem:[%s6962_s1 + $0x4d8] sm:$0xf]  ;;  %v3174_v32 = vor.u32 %v4350_v22, %v3173_v17  ;;  %v4339_v38 = vld [vmem:[%s6962_s1 + $0x1e8] sm:$0xf0]  ;;  %v2177_v39 = vand.u32 %v4230_v25, %v4710_v19 }
  0x32   :  { %v4438_v33 = vld [vmem:[%s6962_s1 + $0x500] sm:$0xf0]  ;;  %v3610_v34 = vor.u32 %v4454_v23, %v3607_v24  ;;  %v3481_v44 = vld [vmem:[%s6962_s1 + $0x480] sm:$0xf]  ;;  %v3130_v45 = vor.u32 %v4339_v38, %v3129_v37  ;;  %v4427_v46 = vld [vmem:[%s6962_s1 + $0x4a8] sm:$0xf0] }
  0x33   :  { %2290 = vmatpush.bf16.msrb.mxu1 %v3786_v35  ;;  %v3877_v35 = vld [vmem:[%s6962_s1 + $0x798] sm:$0xf]  ;;  %v4526_v36 = vld [vmem:[%s6962_s1 + $0x7c0] sm:$0xf0]  ;;  %v3526_v42 = vor.u32 %v4438_v33, %v3525_v31  ;;  %v4515_v48 = vld [vmem:[%s6962_s1 + $0x768] sm:$0xf0]  ;;  %v3482_v54 = vor.u32 %v4427_v46, %v3481_v44 }
  0x34   :  { %2263 = vmatpush.bf16.msrb.mxu3 %v3038_v40  ;;  %2277 = vmatpush.bf16.msrb.mxu0 %v3390_v41  ;;  %v4185_v40 = vld [vmem:[%s6962_s1 + $0xa00] sm:$0xf]  ;;  %v4603_v41 = vld [vmem:[%s6962_s1 + $0xa28] sm:$0xf0]  ;;  %v3085_v49 = vld [vmem:[%s6962_s1 + $0x168] sm:$0xf] }
  0x35   :  { %2306 = vmatpush.bf16.msrb.mxu2 %v4050_v43  ;;  %v3878_v43 = vor.u32 %v4526_v36, %v3877_v35  ;;  %v4328_v50 = vld [vmem:[%s6962_s1 + $0x190] sm:$0xf0]  ;;  %v4186_v51 = vor.u32 %v4603_v41, %v4185_v40  ;;  %v3789_v59 = vld [vmem:[%s6962_s1 + $0x6e8] sm:$0xf]  ;;  %v3041_v62 = vld [vmem:[%s6962_s1 + $0x110] sm:$0xf] }
  0x36   :  { %v3086_v57 = vor.u32 %v4328_v50, %v3085_v49  ;;  %v4416_v58 = vld [vmem:[%s6962_s1 + $0x450] sm:$0xf0]  ;;  %v4317_v63 = vld [vmem:[%s6962_s1 + $0x138] sm:$0xf0]  ;;  %v4097_v1 = vld [vmem:[%s6962_s1 + $0x950] sm:$0xf] }
  0x37   :  { %2291 = vmatpush.bf16.msrb.mxu1 %v3742_v47  ;;  %v3833_v47 = vld [vmem:[%s6962_s1 + $0x740] sm:$0xf]  ;;  %v4581_v2 = vld [vmem:[%s6962_s1 + $0x978] sm:$0xf0]  ;;  %v3745_v8 = vld [vmem:[%s6962_s1 + $0x690] sm:$0xf] }
  0x38   :  { %2264 = vmatpush.bf16.msrb.mxu3 %v2994_v52  ;;  %2278 = vmatpush.bf16.msrb.mxu0 %v3346_v53  ;;  %v4141_v52 = vld [vmem:[%s6962_s1 + $0x9a8] sm:$0xf]  ;;  %v4592_v53 = vld [vmem:[%s6962_s1 + $0x9d0] sm:$0xf0]  ;;  %v3834_v55 = vor.u32 %v4515_v48, %v3833_v47  ;;  %v4405_v7 = vld [vmem:[%s6962_s1 + $0x3f8] sm:$0xf0]  ;;  %v4098_v13 = vor.u32 %v4581_v2, %v4097_v1 }
  0x39   :  { %2307 = vmatpush.bf16.msrb.mxu2 %v4006_v56  ;;  %v3437_v56 = vld [vmem:[%s6962_s1 + $0x428] sm:$0xf]  ;;  %v4142_v0 = vor.u32 %v4592_v53, %v4141_v52  ;;  %v4493_v9 = vld [vmem:[%s6962_s1 + $0x6b8] sm:$0xf0]  ;;  %v4306_v12 = vld [vmem:[%s6962_s1 + $0xe0] sm:$0xf0] }
  0x3a   :  { %v3438_v3 = vor.u32 %v4416_v58, %v3437_v56  ;;  %v4053_v14 = vld [vmem:[%s6962_s1 + $0x8f8] sm:$0xf]  ;;  %v3746_v17 = vor.u32 %v4493_v9, %v3745_v8  ;;  %v4394_v22 = vld [vmem:[%s6962_s1 + $0x3a0] sm:$0xf0]  ;;  %v2953_v25 = vld [vmem:[%s6962_s1 + $0x60] sm:$0xf] }
  0x3b   :  { %2292 = vmatpush.bf16.msrb.mxu1 %v3698_v61  ;;  %v4504_v61 = vld [vmem:[%s6962_s1 + $0x710] sm:$0xf0]  ;;  %v3349_v20 = vld [vmem:[%s6962_s1 + $0x378] sm:$0xf]  ;;  %v4482_v24 = vld [vmem:[%s6962_s1 + $0x660] sm:$0xf0] }
  0x3c   :  { %2265 = vmatpush.bf16.msrb.mxu3 %v2950_v5  ;;  %2279 = vmatpush.bf16.msrb.mxu0 %v3302_v6  ;;  %v3790_v4 = vor.u32 %v4504_v61, %v3789_v59  ;;  %v3393_v5 = vld [vmem:[%s6962_s1 + $0x3d0] sm:$0xf]  ;;  %v3042_v6 = vor.u32 %v4317_v63, %v3041_v62  ;;  %v3701_v23 = vld [vmem:[%s6962_s1 + $0x638] sm:$0xf]  ;;  %v3350_v31 = vor.u32 %v4394_v22, %v3349_v20  ;;  %v3305_v33 = vld [vmem:[%s6962_s1 + $0x320] sm:$0xf] }
  0x3d   :  { %2308 = vmatpush.bf16.msrb.mxu2 %v3962_v10  ;;  %v2997_v10 = vld [vmem:[%s6962_s1 + $0xb8] sm:$0xf]  ;;  %v2909_v35 = vld [vmem:[%s6962_s1 + $0x8] sm:$0xf]  ;;  %v4284_v37 = vld [vmem:[%s6962_s1 + $0x30] sm:$0xf0] }
  0x3e   :  { %v2998_v21 = vor.u32 %v4306_v12, %v2997_v10  ;;  %v3657_v38 = vld [vmem:[%s6962_s1 + $0x5e0] sm:$0xf]  ;;  %v4444_v41 = vld [vmem:[%s6962_s1 + $0x534] sm:$0xf]  ;;  %v3261_v49 = vld [vmem:[%s6962_s1 + $0x2c8] sm:$0xf]  ;;  %v2910_v52 = vor.u32 %v4284_v37, %v2909_v35 }
  0x3f   :  { %2293 = vmatpush.bf16.msrb.mxu1 %v3654_v16  ;;  %v3394_v16 = vor.u32 %v4405_v7, %v3393_v5  ;;  %v3571_v44 = vld [vmem:[%s6962_s1 + $0x55c] sm:$0xf0]  ;;  %v4548_v46 = vld [vmem:[%s6962_s1 + $0x870] sm:$0xf0]  ;;  %v4433_v63 = vld [vmem:[%s6962_s1 + $0x4dc] sm:$0xf] }
  0x40   :  { %2266 = vmatpush.bf16.msrb.mxu3 %v2906_v26  ;;  %2280 = vmatpush.bf16.msrb.mxu0 %v3258_v27  ;;  %v4295_v26 = vld [vmem:[%s6962_s1 + $0x88] sm:$0xf0]  ;;  %v4356_v50 = vld [vmem:[%s6962_s1 + $0x274] sm:$0xf]  ;;  %v3923_v59 = vld [vmem:[%s6962_s1 + $0x81c] sm:$0xf0] }
  0x41   :  { %2315 = vmatpush.bf16.msra.mxu2 %v3218_v15  ;;  %v4570_v15 = vld [vmem:[%s6962_s1 + $0x920] sm:$0xf0]  ;;  %v2954_v36 = vor.u32 %v4295_v26, %v2953_v25  ;;  %v4372_v53 = vld [vmem:[%s6962_s1 + $0x2f0] sm:$0xf0]  ;;  %v4521_v7 = vld [vmem:[%s6962_s1 + $0x79c] sm:$0xf] }
  0x42   :  { %4264 = vmatmul.msk.bf16.vlgmr.msrb.gmra.mxu2 %vm2162_vm2, %v4921_v60  ;;  %v4054_v27 = vor.u32 %v4570_v15, %v4053_v14  ;;  %v4532_v58 = vld [vmem:[%s6962_s1 + $0x7f4] sm:$0xf]  ;;  %v3262_v1 = vor.u32 %v4372_v53, %v3261_v49  ;;  %v3879_v9 = vld [vmem:[%s6962_s1 + $0x7c4] sm:$0xf0]  ;;  %v4598_v10 = vld [vmem:[%s6962_s1 + $0xa04] sm:$0xf] }
  0x43   :  { %2294 = vmatpush.bf16.msrb.mxu1 %v3610_v34  ;;  %2267 = vmatmul.bf16.vlgmr.msrb.gmra.mxu3 %v4972_v18  ;;  %v4383_v34 = vld [vmem:[%s6962_s1 + $0x348] sm:$0xf0]  ;;  %v3926_v5 = vor.u32 %v4532_v58, %v3923_v59  ;;  %v4187_v12 = vld [vmem:[%s6962_s1 + $0xa2c] sm:$0xf0]  ;;  %v4422_v14 = vld [vmem:[%s6962_s1 + $0x484] sm:$0xf]  ;;  %v3882_v20 = vor.u32 %v4521_v7, %v3879_v9 }
  0x44   :  { %2329 = vmatpush.bf16.msra.mxu3 %v3570_v28  ;;  %2343 = vmatpush.bf16.msra.mxu0 %v3922_v29  ;;  %v4009_v28 = vld [vmem:[%s6962_s1 + $0x8a0] sm:$0xf]  ;;  %v4559_v29 = vld [vmem:[%s6962_s1 + $0x8c8] sm:$0xf0]  ;;  %v3306_v47 = vor.u32 %v4383_v34, %v3305_v33  ;;  %v3483_v15 = vld [vmem:[%s6962_s1 + $0x4ac] sm:$0xf0] }
  0x45   :  { %2316 = vmatpush.bf16.msra.mxu2 %v3174_v32  ;;  %2281 = vmatmul.bf16.vlgmr.msrb.gmra.mxu0 %v4997_v30  ;;  %v3702_v32 = vor.u32 %v4482_v24, %v3701_v23  ;;  %v4010_v40 = vor.u32 %v4559_v29, %v4009_v28  ;;  %v4510_v22 = vld [vmem:[%s6962_s1 + $0x744] sm:$0xf]  ;;  %v3486_v23 = vor.u32 %v4422_v14, %v3483_v15  ;;  %v3835_v24 = vld [vmem:[%s6962_s1 + $0x76c] sm:$0xf0]  ;;  %v4587_v25 = vld [vmem:[%s6962_s1 + $0x9ac] sm:$0xf] }
  0x46   :  { %2295 = vmatmul.bf16.vlgmr.msrb.gmra.mxu1 %v4955_v11  ;;  %v4143_v26 = vld [vmem:[%s6962_s1 + $0x9d4] sm:$0xf0]  ;;  %v4411_v28 = vld [vmem:[%s6962_s1 + $0x42c] sm:$0xf] }
  0x47   :  { %2358 = vmatpush.bf16.msra.mxu1 %v2177_v39  ;;  %v4471_v39 = vld [vmem:[%s6962_s1 + $0x608] sm:$0xf0]  ;;  %v3439_v29 = vld [vmem:[%s6962_s1 + $0x454] sm:$0xf0] }
  0x48   :  { %2330 = vmatpush.bf16.msra.mxu3 %v3526_v42  ;;  %2344 = vmatpush.bf16.msra.mxu0 %v3878_v43  ;;  %v4609_v42 = vld [vmem:[%s6962_s1 + $0xa5c] sm:$0xf]  ;;  %v4231_v43 = vld [vmem:[%s6962_s1 + $0xa84] sm:$0xf0]  ;;  %v3658_v48 = vor.u32 %v4471_v39, %v3657_v38 }
  0x49   :  { %2317 = vmatpush.bf16.msra.mxu2 %v3130_v45  ;;  %v3965_v45 = vld [vmem:[%s6962_s1 + $0x848] sm:$0xf]  ;;  %v4234_v56 = vor.u32 %v4609_v42, %v4231_v43 }
  0x4a   :  { %v3966_v61 = vor.u32 %v4548_v46, %v3965_v45 }
  0x4b   :  { %2359 = vmatpush.bf16.msra.mxu1 %v4186_v51  ;;  %v3219_v51 = vld [vmem:[%s6962_s1 + $0x29c] sm:$0xf0] }
  0x4c   :  { %2331 = vmatpush.bf16.msra.mxu3 %v3482_v54  ;;  %2345 = vmatpush.bf16.msra.mxu0 %v3834_v55  ;;  %v3613_v54 = vld [vmem:[%s6962_s1 + $0x588] sm:$0xf]  ;;  %v4460_v55 = vld [vmem:[%s6962_s1 + $0x5b0] sm:$0xf0]  ;;  %v3222_v62 = vor.u32 %v4356_v50, %v3219_v51 }
  0x4d   :  { %2318 = vmatpush.bf16.msra.mxu2 %v3086_v57  ;;  %v3574_v57 = vor.u32 %v4444_v41, %v3571_v44  ;;  %v3614_v2 = vor.u32 %v4460_v55, %v3613_v54 }
  0x4f   :  { %2360 = vmatpush.bf16.msra.mxu1 %v4142_v0  ;;  %v3527_v0 = vld [vmem:[%s6962_s1 + $0x504] sm:$0xf0] }
  0x50   :  { %2332 = vmatpush.bf16.msra.mxu3 %v3438_v3  ;;  %2346 = vmatpush.bf16.msra.mxu0 %v3790_v4  ;;  %v4345_v3 = vld [vmem:[%s6962_s1 + $0x21c] sm:$0xf]  ;;  %v3175_v4 = vld [vmem:[%s6962_s1 + $0x244] sm:$0xf0]  ;;  %v3530_v8 = vor.u32 %v4433_v63, %v3527_v0 }
  0x51   :  { %2319 = vmatpush.bf16.msra.mxu2 %v3042_v6  ;;  %v2180_v6 = vand.u32 %v4234_v56, %v4710_v19 }
  0x53   :  { %2361 = vmatpush.bf16.msra.mxu1 %v4098_v13  ;;  %v3178_v13 = vor.u32 %v4345_v3, %v3175_v4 }
  0x54   :  { %2333 = vmatpush.bf16.msra.mxu3 %v3394_v16  ;;  %2347 = vmatpush.bf16.msra.mxu0 %v3746_v17  ;;  %v4334_v16 = vld [vmem:[%s6962_s1 + $0x1c4] sm:$0xf]  ;;  %v3131_v17 = vld [vmem:[%s6962_s1 + $0x1ec] sm:$0xf0] }
  0x55   :  { %2320 = vmatpush.bf16.msra.mxu2 %v2998_v21  ;;  %v4190_v21 = vor.u32 %v4598_v10, %v4187_v12 }
  0x57   :  { %2362 = vmatpush.bf16.msra.mxu1 %v4054_v27  ;;  %v3134_v27 = vor.u32 %v4334_v16, %v3131_v17 }
  0x58   :  { %2334 = vmatpush.bf16.msra.mxu3 %v3350_v31  ;;  %2348 = vmatpush.bf16.msra.mxu0 %v3702_v32  ;;  %v4323_v31 = vld [vmem:[%s6962_s1 + $0x16c] sm:$0xf]  ;;  %v3087_v32 = vld [vmem:[%s6962_s1 + $0x194] sm:$0xf0] }
  0x59   :  { %2321 = vmatpush.bf16.msra.mxu2 %v2954_v36 }
  0x5b   :  { %2363 = vmatpush.bf16.msra.mxu1 %v4010_v40 }
  0x5c   :  { %2335 = vmatpush.bf16.msra.mxu3 %v3306_v47  ;;  %2349 = vmatpush.bf16.msra.mxu0 %v3658_v48 }
  0x5d   :  { %2322 = vmatpush.bf16.msra.mxu2 %v2910_v52 }
  0x5f   :  { %2364 = vmatpush.bf16.msra.mxu1 %v3966_v61 }
  0x60   :  { %2336 = vmatpush.bf16.msra.mxu3 %v3262_v1  ;;  %2350 = vmatpush.bf16.msra.mxu0 %v3614_v2 }
  0x61   :  { %2385 = vmatpush.bf16.msrb.mxu2 %v3574_v57 }
  0x62   :  { %4265 = vmatmul.msk.bf16.vlgmr.msra.gmra.mxu1 %vm2162_vm2, %v4921_v60  ;;  %2323 = vmatmul.bf16.vlgmr.msra.gmra.mxu2 %v4972_v18 }
  0x63   :  { %2371 = vmatpush.bf16.msrb.mxu1 %v3222_v62  ;;  %2337 = vmatmul.bf16.vlgmr.msra.gmra.mxu3 %v4997_v30 }
  0x64   :  { %2399 = vmatpush.bf16.msrb.mxu3 %v3926_v5  ;;  %2414 = vmatpush.bf16.msrb.mxu0 %v2180_v6 }
  0x65   :  { %2386 = vmatpush.bf16.msrb.mxu2 %v3530_v8  ;;  %2351 = vmatmul.bf16.vlgmr.msra.gmra.mxu0 %v4955_v11 }
  0x67   :  { %2372 = vmatpush.bf16.msrb.mxu1 %v3178_v13 }
  0x68   :  { %8 = vsyncpa [#allocation3], 0  ;;  %2400 = vmatpush.bf16.msrb.mxu3 %v3882_v20  ;;  %2415 = vmatpush.bf16.msrb.mxu0 %v4190_v21  ;;  %v3838_v33 = vor.u32 %v4510_v22, %v3835_v24  ;;  %v4146_v34 = vor.u32 %v4587_v25, %v4143_v26  ;;  %v4499_v35 = vld [vmem:[%s6962_s1 + $0x6ec] sm:$0xf]  ;;  %v3442_v36 = vor.u32 %v4411_v28, %v3439_v29  ;;  %v3791_v37 = vld [vmem:[%s6962_s1 + $0x714] sm:$0xf0] }
  0x69   :  { %2387 = vmatpush.bf16.msrb.mxu2 %v3486_v23  ;;  %v4576_v38 = vld [vmem:[%s6962_s1 + $0x954] sm:$0xf]  ;;  %v4099_v39 = vld [vmem:[%s6962_s1 + $0x97c] sm:$0xf0]  ;;  %v3090_v40 = vor.u32 %v4323_v31, %v3087_v32  ;;  %v3794_v45 = vor.u32 %v4499_v35, %v3791_v37  ;;  %v4565_v50 = vld [vmem:[%s6962_s1 + $0x8fc] sm:$0xf] }
  0x6a   :  { %v4400_v41 = vld [vmem:[%s6962_s1 + $0x3d4] sm:$0xf]  ;;  %v3395_v42 = vld [vmem:[%s6962_s1 + $0x3fc] sm:$0xf0]  ;;  %v4102_v46 = vor.u32 %v4576_v38, %v4099_v39  ;;  %v4055_v51 = vld [vmem:[%s6962_s1 + $0x924] sm:$0xf0] }
  0x6b   :  { %2373 = vmatpush.bf16.msrb.mxu1 %v3134_v27  ;;  %v4312_v43 = vld [vmem:[%s6962_s1 + $0x114] sm:$0xf]  ;;  %v3043_v44 = vld [vmem:[%s6962_s1 + $0x13c] sm:$0xf0]  ;;  %v3398_v48 = vor.u32 %v4400_v41, %v3395_v42  ;;  %v4389_v53 = vld [vmem:[%s6962_s1 + $0x37c] sm:$0xf]  ;;  %v4058_v58 = vor.u32 %v4565_v50, %v4055_v51 }
  0x6c   :  { %2401 = vmatpush.bf16.msrb.mxu3 %v3838_v33  ;;  %2416 = vmatpush.bf16.msrb.mxu0 %v4146_v34  ;;  %v4488_v47 = vld [vmem:[%s6962_s1 + $0x694] sm:$0xf]  ;;  %v3747_v49 = vld [vmem:[%s6962_s1 + $0x6bc] sm:$0xf0]  ;;  %v3046_v52 = vor.u32 %v4312_v43, %v3043_v44  ;;  %v3351_v54 = vld [vmem:[%s6962_s1 + $0x3a4] sm:$0xf0] }
  0x6d   :  { %2388 = vmatpush.bf16.msrb.mxu2 %v3442_v36  ;;  %v4301_v55 = vld [vmem:[%s6962_s1 + $0xbc] sm:$0xf]  ;;  %v2999_v56 = vld [vmem:[%s6962_s1 + $0xe4] sm:$0xf0]  ;;  %v3750_v57 = vor.u32 %v4488_v47, %v3747_v49  ;;  %v3354_v61 = vor.u32 %v4389_v53, %v3351_v54  ;;  %v4554_v63 = vld [vmem:[%s6962_s1 + $0x8a4] sm:$0xf] }
  0x6e   :  { %v4477_v59 = vld [vmem:[%s6962_s1 + $0x63c] sm:$0xf]  ;;  %v3703_v62 = vld [vmem:[%s6962_s1 + $0x664] sm:$0xf0]  ;;  %v4011_v0 = vld [vmem:[%s6962_s1 + $0x8cc] sm:$0xf0]  ;;  %v3002_v1 = vor.u32 %v4301_v55, %v2999_v56 }
  0x6f   :  { %2374 = vmatpush.bf16.msrb.mxu1 %v3090_v40  ;;  %v4378_v2 = vld [vmem:[%s6962_s1 + $0x324] sm:$0xf]  ;;  %v3307_v3 = vld [vmem:[%s6962_s1 + $0x34c] sm:$0xf0]  ;;  %v3706_v8 = vor.u32 %v4477_v59, %v3703_v62  ;;  %v4014_v9 = vor.u32 %v4554_v63, %v4011_v0  ;;  %v4367_v10 = vld [vmem:[%s6962_s1 + $0x2cc] sm:$0xf] }
  0x70   :  { %2402 = vmatpush.bf16.msrb.mxu3 %v3794_v45  ;;  %2417 = vmatpush.bf16.msrb.mxu0 %v4102_v46  ;;  %v4466_v4 = vld [vmem:[%s6962_s1 + $0x5e4] sm:$0xf]  ;;  %v3659_v5 = vld [vmem:[%s6962_s1 + $0x60c] sm:$0xf0]  ;;  %v3263_v12 = vld [vmem:[%s6962_s1 + $0x2f4] sm:$0xf0]  ;;  %v3310_v14 = vor.u32 %v4378_v2, %v3307_v3 }
  0x71   :  { %2389 = vmatpush.bf16.msrb.mxu2 %v3398_v48  ;;  %v4290_v6 = vld [vmem:[%s6962_s1 + $0x64] sm:$0xf]  ;;  %v2955_v7 = vld [vmem:[%s6962_s1 + $0x8c] sm:$0xf0]  ;;  %v4543_v13 = vld [vmem:[%s6962_s1 + $0x84c] sm:$0xf]  ;;  %v3662_v27 = vor.u32 %v4466_v4, %v3659_v5  ;;  %v3266_v32 = vor.u32 %v4367_v10, %v3263_v12 }
  0x72   :  { %v3967_v15 = vld [vmem:[%s6962_s1 + $0x874] sm:$0xf0]  ;;  %v4362_v17 = vld [vmem:[%s6962_s1 + $0x2a0] sm:$0xf0]  ;;  %v2958_v20 = vor.u32 %v4290_v6, %v2955_v7  ;;  %v4237_v22 = vld [vmem:[%s6962_s1 + $0xa60] sm:$0xf] }
  0x73   :  { %2375 = vmatpush.bf16.msrb.mxu1 %v3046_v52  ;;  %v3225_v16 = vld [vmem:[%s6962_s1 + $0x278] sm:$0xf]  ;;  %v4615_v23 = vld [vmem:[%s6962_s1 + $0xa88] sm:$0xf0]  ;;  %v4538_v24 = vld [vmem:[%s6962_s1 + $0x820] sm:$0xf0]  ;;  %v3970_v28 = vor.u32 %v4543_v13, %v3967_v15 }
  0x74   :  { %2403 = vmatpush.bf16.msrb.mxu3 %v3750_v57  ;;  %2418 = vmatpush.bf16.msrb.mxu0 %v4058_v58  ;;  %v3929_v21 = vld [vmem:[%s6962_s1 + $0x7f8] sm:$0xf]  ;;  %v4279_v25 = vld [vmem:[%s6962_s1 + $0xc] sm:$0xf]  ;;  %v4450_v31 = vld [vmem:[%s6962_s1 + $0x560] sm:$0xf0]  ;;  %v3226_v33 = vor.u32 %v4362_v17, %v3225_v16  ;;  %v4238_v36 = vor.u32 %v4615_v23, %v4237_v22 }
  0x75   :  { %2390 = vmatpush.bf16.msrb.mxu2 %v3354_v61  ;;  %v2911_v26 = vld [vmem:[%s6962_s1 + $0x34] sm:$0xf0]  ;;  %v4455_v34 = vld [vmem:[%s6962_s1 + $0x58c] sm:$0xf]  ;;  %v3930_v37 = vor.u32 %v4538_v24, %v3929_v21  ;;  %v3181_v39 = vld [vmem:[%s6962_s1 + $0x220] sm:$0xf] }
  0x76   :  { %v3577_v29 = vld [vmem:[%s6962_s1 + $0x538] sm:$0xf]  ;;  %v2914_v38 = vor.u32 %v4279_v25, %v2911_v26  ;;  %v4351_v40 = vld [vmem:[%s6962_s1 + $0x248] sm:$0xf0]  ;;  %v3885_v42 = vld [vmem:[%s6962_s1 + $0x7a0] sm:$0xf]  ;;  %v2183_v47 = vand.u32 %v4238_v36, %v4710_v19 }
  0x77   :  { %2376 = vmatpush.bf16.msrb.mxu1 %v3002_v1  ;;  %v3615_v35 = vld [vmem:[%s6962_s1 + $0x5b4] sm:$0xf0]  ;;  %v3578_v41 = vor.u32 %v4450_v31, %v3577_v29  ;;  %v4527_v43 = vld [vmem:[%s6962_s1 + $0x7c8] sm:$0xf0]  ;;  %v3533_v45 = vld [vmem:[%s6962_s1 + $0x4e0] sm:$0xf]  ;;  %v3182_v48 = vor.u32 %v4351_v40, %v3181_v39 }
  0x78   :  { %2404 = vmatpush.bf16.msrb.mxu3 %v3706_v8  ;;  %2419 = vmatpush.bf16.msrb.mxu0 %v4014_v9  ;;  %v3618_v44 = vor.u32 %v4455_v34, %v3615_v35  ;;  %v4439_v46 = vld [vmem:[%s6962_s1 + $0x508] sm:$0xf0]  ;;  %v4193_v49 = vld [vmem:[%s6962_s1 + $0xa08] sm:$0xf]  ;;  %v3886_v50 = vor.u32 %v4527_v43, %v3885_v42  ;;  %v4604_v51 = vld [vmem:[%s6962_s1 + $0xa30] sm:$0xf0] }
  0x79   :  { %2391 = vmatpush.bf16.msrb.mxu2 %v3310_v14  ;;  %v3137_v52 = vld [vmem:[%s6962_s1 + $0x1c8] sm:$0xf]  ;;  %v4340_v53 = vld [vmem:[%s6962_s1 + $0x1f0] sm:$0xf0]  ;;  %v3534_v54 = vor.u32 %v4439_v46, %v3533_v45  ;;  %v4194_v59 = vor.u32 %v4604_v51, %v4193_v49  ;;  %v4149_v62 = vld [vmem:[%s6962_s1 + $0x9b0] sm:$0xf] }
  0x7a   :  { %v3841_v55 = vld [vmem:[%s6962_s1 + $0x748] sm:$0xf]  ;;  %v4516_v56 = vld [vmem:[%s6962_s1 + $0x770] sm:$0xf0]  ;;  %v3138_v61 = vor.u32 %v4340_v53, %v3137_v52  ;;  %v4593_v0 = vld [vmem:[%s6962_s1 + $0x9d8] sm:$0xf0] }
  0x7b   :  { %2377 = vmatpush.bf16.msrb.mxu1 %v2958_v20  ;;  %v3489_v57 = vld [vmem:[%s6962_s1 + $0x488] sm:$0xf]  ;;  %v4428_v58 = vld [vmem:[%s6962_s1 + $0x4b0] sm:$0xf0]  ;;  %v3842_v63 = vor.u32 %v4516_v56, %v3841_v55  ;;  %v3093_v1 = vld [vmem:[%s6962_s1 + $0x170] sm:$0xf]  ;;  %v4150_v8 = vor.u32 %v4593_v0, %v4149_v62 }
  0x7c   :  { %2405 = vmatpush.bf16.msrb.mxu3 %v3662_v27  ;;  %2420 = vmatpush.bf16.msrb.mxu0 %v3970_v28  ;;  %v4329_v2 = vld [vmem:[%s6962_s1 + $0x198] sm:$0xf0]  ;;  %v3490_v3 = vor.u32 %v4428_v58, %v3489_v57  ;;  %v3797_v4 = vld [vmem:[%s6962_s1 + $0x6f0] sm:$0xf]  ;;  %v4105_v10 = vld [vmem:[%s6962_s1 + $0x958] sm:$0xf] }
  0x7d   :  { %2392 = vmatpush.bf16.msrb.mxu2 %v3266_v32  ;;  %v4505_v5 = vld [vmem:[%s6962_s1 + $0x718] sm:$0xf0]  ;;  %v3445_v6 = vld [vmem:[%s6962_s1 + $0x430] sm:$0xf]  ;;  %v3094_v9 = vor.u32 %v4329_v2, %v3093_v1  ;;  %v4582_v13 = vld [vmem:[%s6962_s1 + $0x980] sm:$0xf0] }
  0x7e   :  { %v4417_v7 = vld [vmem:[%s6962_s1 + $0x458] sm:$0xf0]  ;;  %v3798_v12 = vor.u32 %v4505_v5, %v3797_v4  ;;  %v3049_v14 = vld [vmem:[%s6962_s1 + $0x118] sm:$0xf]  ;;  %v4318_v15 = vld [vmem:[%s6962_s1 + $0x140] sm:$0xf0]  ;;  %v4106_v23 = vor.u32 %v4582_v13, %v4105_v10 }
  0x7f   :  { %2378 = vmatpush.bf16.msrb.mxu1 %v2914_v38  ;;  %4266 = vmatmul.msk.bf16.vlgmr.msrb.gmra.mxu0 %vm2162_vm2, %v4921_v60  ;;  %v3446_v16 = vor.u32 %v4417_v7, %v3445_v6  ;;  %v3753_v17 = vld [vmem:[%s6962_s1 + $0x698] sm:$0xf]  ;;  %v4494_v20 = vld [vmem:[%s6962_s1 + $0x6c0] sm:$0xf0]  ;;  %v3050_v24 = vor.u32 %v4318_v15, %v3049_v14  ;;  %v4061_v25 = vld [vmem:[%s6962_s1 + $0x900] sm:$0xf] }
  0x80   :  { %2427 = vmatpush.bf16.msra.mxu0 %v3226_v33  ;;  %2406 = vmatpush.bf16.msrb.mxu3 %v3618_v44  ;;  %v3401_v21 = vld [vmem:[%s6962_s1 + $0x3d8] sm:$0xf]  ;;  %v4406_v22 = vld [vmem:[%s6962_s1 + $0x400] sm:$0xf0]  ;;  %v3754_v26 = vor.u32 %v4494_v20, %v3753_v17  ;;  %v4571_v27 = vld [vmem:[%s6962_s1 + $0x928] sm:$0xf0] }
  0x81   :  { %2455 = vmatpush.bf16.msra.mxu2 %v3930_v37  ;;  %v3005_v28 = vld [vmem:[%s6962_s1 + $0xc0] sm:$0xf]  ;;  %v4307_v29 = vld [vmem:[%s6962_s1 + $0xe8] sm:$0xf0]  ;;  %v3402_v31 = vor.u32 %v4406_v22, %v3401_v21  ;;  %v4062_v36 = vor.u32 %v4571_v27, %v4061_v25  ;;  %v4017_v38 = vld [vmem:[%s6962_s1 + $0x8a8] sm:$0xf] }
  0x82   :  { %2393 = vmatmul.bf16.vlgmr.msrb.gmra.mxu2 %v4997_v30  ;;  %2379 = vmatmul.bf16.vlgmr.msrb.gmra.mxu1 %v4972_v18  ;;  %v3709_v32 = vld [vmem:[%s6962_s1 + $0x640] sm:$0xf]  ;;  %v4483_v33 = vld [vmem:[%s6962_s1 + $0x668] sm:$0xf0]  ;;  %v3006_v37 = vor.u32 %v4307_v29, %v3005_v28  ;;  %v4560_v40 = vld [vmem:[%s6962_s1 + $0x8d0] sm:$0xf0] }
  0x83   :  { %2441 = vmatpush.bf16.msra.mxu1 %v3578_v41  ;;  %2407 = vmatmul.bf16.vlgmr.msrb.gmra.mxu3 %v4955_v11  ;;  %v3357_v34 = vld [vmem:[%s6962_s1 + $0x380] sm:$0xf]  ;;  %v4395_v35 = vld [vmem:[%s6962_s1 + $0x3a8] sm:$0xf0]  ;;  %v3710_v39 = vor.u32 %v4483_v33, %v3709_v32  ;;  %v2961_v41 = vld [vmem:[%s6962_s1 + $0x68] sm:$0xf] }
  0x84   :  { %2470 = vmatpush.bf16.msra.mxu3 %v2183_v47  ;;  %2428 = vmatpush.bf16.msra.mxu0 %v3182_v48  ;;  %v4296_v42 = vld [vmem:[%s6962_s1 + $0x90] sm:$0xf0]  ;;  %v3358_v43 = vor.u32 %v4395_v35, %v3357_v34  ;;  %v3665_v44 = vld [vmem:[%s6962_s1 + $0x5e8] sm:$0xf]  ;;  %v4610_v46 = vld [vmem:[%s6962_s1 + $0xa64] sm:$0xf] }
  0x85   :  { %2456 = vmatpush.bf16.msra.mxu2 %v3886_v50  ;;  %v4472_v45 = vld [vmem:[%s6962_s1 + $0x610] sm:$0xf0]  ;;  %v3313_v47 = vld [vmem:[%s6962_s1 + $0x328] sm:$0xf]  ;;  %v4239_v49 = vld [vmem:[%s6962_s1 + $0xa8c] sm:$0xf0]  ;;  %v4018_v50 = vor.u32 %v4560_v40, %v4017_v38  ;;  %v2962_v51 = vor.u32 %v4296_v42, %v2961_v41 }
  0x86   :  { %v4384_v48 = vld [vmem:[%s6962_s1 + $0x350] sm:$0xf0]  ;;  %v3973_v52 = vld [vmem:[%s6962_s1 + $0x850] sm:$0xf]  ;;  %v4549_v53 = vld [vmem:[%s6962_s1 + $0x878] sm:$0xf0] }
  0x87   :  { %2442 = vmatpush.bf16.msra.mxu1 %v3534_v54  ;;  %v3666_v54 = vor.u32 %v4472_v45, %v3665_v44  ;;  %v4357_v55 = vld [vmem:[%s6962_s1 + $0x27c] sm:$0xf]  ;;  %v2917_v56 = vld [vmem:[%s6962_s1 + $0x10] sm:$0xf]  ;;  %v3227_v58 = vld [vmem:[%s6962_s1 + $0x2a4] sm:$0xf0]  ;;  %v3974_v2 = vor.u32 %v4549_v53, %v3973_v52 }
  0x88   :  { %2471 = vmatpush.bf16.msra.mxu3 %v4194_v59  ;;  %2429 = vmatpush.bf16.msra.mxu0 %v3138_v61  ;;  %v4285_v57 = vld [vmem:[%s6962_s1 + $0x38] sm:$0xf0]  ;;  %v3314_v59 = vor.u32 %v4384_v48, %v3313_v47  ;;  %v3621_v61 = vld [vmem:[%s6962_s1 + $0x590] sm:$0xf]  ;;  %v3579_v1 = vld [vmem:[%s6962_s1 + $0x564] sm:$0xf0]  ;;  %v3230_v6 = vor.u32 %v4357_v55, %v3227_v58 }
  0x89   :  { %2457 = vmatpush.bf16.msra.mxu2 %v3842_v63  ;;  %v4461_v62 = vld [vmem:[%s6962_s1 + $0x5b8] sm:$0xf0]  ;;  %v4242_v63 = vor.u32 %v4610_v46, %v4239_v49  ;;  %v3269_v4 = vld [vmem:[%s6962_s1 + $0x2d0] sm:$0xf]  ;;  %v4346_v13 = vld [vmem:[%s6962_s1 + $0x224] sm:$0xf] }
  0x8a   :  { %v4445_v0 = vld [vmem:[%s6962_s1 + $0x53c] sm:$0xf]  ;;  %v3622_v7 = vor.u32 %v4461_v62, %v3621_v61  ;;  %v3183_v14 = vld [vmem:[%s6962_s1 + $0x24c] sm:$0xf0]  ;;  %v4434_v15 = vld [vmem:[%s6962_s1 + $0x4e4] sm:$0xf] }
  0x8b   :  { %2443 = vmatpush.bf16.msra.mxu1 %v3490_v3  ;;  %v2918_v3 = vor.u32 %v4285_v57, %v2917_v56  ;;  %v4373_v5 = vld [vmem:[%s6962_s1 + $0x2f8] sm:$0xf0]  ;;  %v3582_v10 = vor.u32 %v4445_v0, %v3579_v1  ;;  %v3535_v17 = vld [vmem:[%s6962_s1 + $0x50c] sm:$0xf0]  ;;  %v4599_v20 = vld [vmem:[%s6962_s1 + $0xa0c] sm:$0xf] }
  0x8c   :  { %2472 = vmatpush.bf16.msra.mxu3 %v4150_v8  ;;  %2430 = vmatpush.bf16.msra.mxu0 %v3094_v9  ;;  %v4533_v8 = vld [vmem:[%s6962_s1 + $0x7fc] sm:$0xf]  ;;  %v3931_v9 = vld [vmem:[%s6962_s1 + $0x824] sm:$0xf0]  ;;  %v4195_v21 = vld [vmem:[%s6962_s1 + $0xa34] sm:$0xf0] }
  0x8d   :  { %2458 = vmatpush.bf16.msra.mxu2 %v3798_v12  ;;  %v2186_v12 = vand.u32 %v4242_v63, %v4710_v19  ;;  %v3934_v22 = vor.u32 %v4533_v8, %v3931_v9  ;;  %v3887_v25 = vld [vmem:[%s6962_s1 + $0x7cc] sm:$0xf0]  ;;  %v4198_v27 = vor.u32 %v4599_v20, %v4195_v21  ;;  %v4335_v28 = vld [vmem:[%s6962_s1 + $0x1cc] sm:$0xf]  ;;  %v3139_v29 = vld [vmem:[%s6962_s1 + $0x1f4] sm:$0xf0] }
  0x8e   :  { %v3491_v32 = vld [vmem:[%s6962_s1 + $0x4b4] sm:$0xf0]  ;;  %v4588_v33 = vld [vmem:[%s6962_s1 + $0x9b4] sm:$0xf]  ;;  %v4151_v34 = vld [vmem:[%s6962_s1 + $0x9dc] sm:$0xf0] }
  0x8f   :  { %2444 = vmatpush.bf16.msra.mxu1 %v3446_v16  ;;  %v3270_v16 = vor.u32 %v4373_v5, %v3269_v4  ;;  %v3843_v38 = vld [vmem:[%s6962_s1 + $0x774] sm:$0xf0]  ;;  %v4154_v40 = vor.u32 %v4588_v33, %v4151_v34  ;;  %v4324_v41 = vld [vmem:[%s6962_s1 + $0x174] sm:$0xf]  ;;  %v3095_v42 = vld [vmem:[%s6962_s1 + $0x19c] sm:$0xf0] }
  0x90   :  { %2473 = vmatpush.bf16.msra.mxu3 %v4106_v23  ;;  %2431 = vmatpush.bf16.msra.mxu0 %v3050_v24  ;;  %v3186_v23 = vor.u32 %v4346_v13, %v3183_v14  ;;  %v4522_v24 = vld [vmem:[%s6962_s1 + $0x7a4] sm:$0xf]  ;;  %v3447_v44 = vld [vmem:[%s6962_s1 + $0x45c] sm:$0xf0]  ;;  %v4577_v45 = vld [vmem:[%s6962_s1 + $0x95c] sm:$0xf]  ;;  %v3098_v48 = vor.u32 %v4324_v41, %v3095_v42 }
  0x91   :  { %2459 = vmatpush.bf16.msra.mxu2 %v3754_v26  ;;  %v3538_v26 = vor.u32 %v4434_v15, %v3535_v17  ;;  %v3890_v35 = vor.u32 %v4522_v24, %v3887_v25  ;;  %v4107_v46 = vld [vmem:[%s6962_s1 + $0x984] sm:$0xf0]  ;;  %v4500_v49 = vld [vmem:[%s6962_s1 + $0x6f4] sm:$0xf]  ;;  %v4313_v53 = vld [vmem:[%s6962_s1 + $0x11c] sm:$0xf] }
  0x92   :  { %v4110_v52 = vor.u32 %v4577_v45, %v4107_v46  ;;  %v4401_v55 = vld [vmem:[%s6962_s1 + $0x3dc] sm:$0xf]  ;;  %v3403_v56 = vld [vmem:[%s6962_s1 + $0x404] sm:$0xf0]  ;;  %v4566_v57 = vld [vmem:[%s6962_s1 + $0x904] sm:$0xf] }
  0x93   :  { %2445 = vmatpush.bf16.msra.mxu1 %v3402_v31  ;;  %v4423_v31 = vld [vmem:[%s6962_s1 + $0x48c] sm:$0xf]  ;;  %v4063_v58 = vld [vmem:[%s6962_s1 + $0x92c] sm:$0xf0]  ;;  %v4489_v62 = vld [vmem:[%s6962_s1 + $0x69c] sm:$0xf]  ;;  %v3406_v0 = vor.u32 %v4401_v55, %v3403_v56 }
  0x94   :  { %2474 = vmatpush.bf16.msra.mxu3 %v4062_v36  ;;  %2432 = vmatpush.bf16.msra.mxu0 %v3006_v37  ;;  %v3142_v36 = vor.u32 %v4335_v28, %v3139_v29  ;;  %v4511_v37 = vld [vmem:[%s6962_s1 + $0x74c] sm:$0xf]  ;;  %v3755_v63 = vld [vmem:[%s6962_s1 + $0x6c4] sm:$0xf0]  ;;  %v4066_v1 = vor.u32 %v4566_v57, %v4063_v58  ;;  %v4390_v4 = vld [vmem:[%s6962_s1 + $0x384] sm:$0xf] }
  0x95   :  { %2460 = vmatpush.bf16.msra.mxu2 %v3710_v39  ;;  %v3494_v39 = vor.u32 %v4423_v31, %v3491_v32  ;;  %v3846_v47 = vor.u32 %v4511_v37, %v3843_v38  ;;  %v3359_v5 = vld [vmem:[%s6962_s1 + $0x3ac] sm:$0xf0]  ;;  %v3758_v8 = vor.u32 %v4489_v62, %v3755_v63  ;;  %v4379_v17 = vld [vmem:[%s6962_s1 + $0x32c] sm:$0xf]  ;;  %v3315_v20 = vld [vmem:[%s6962_s1 + $0x354] sm:$0xf0] }
  0x96   :  { %v3711_v13 = vld [vmem:[%s6962_s1 + $0x66c] sm:$0xf0]  ;;  %v3362_v14 = vor.u32 %v4390_v4, %v3359_v5  ;;  %v4544_v21 = vld [vmem:[%s6962_s1 + $0x854] sm:$0xf]  ;;  %v4363_v25 = vld [vmem:[%s6962_s1 + $0x2a8] sm:$0xf0]  ;;  %v3318_v33 = vor.u32 %v4379_v17, %v3315_v20 }
  0x97   :  { %2446 = vmatpush.bf16.msra.mxu1 %v3358_v43  ;;  %v4412_v43 = vld [vmem:[%s6962_s1 + $0x434] sm:$0xf]  ;;  %v3585_v29 = vld [vmem:[%s6962_s1 + $0x540] sm:$0xf]  ;;  %v4467_v31 = vld [vmem:[%s6962_s1 + $0x5ec] sm:$0xf] }
  0x98   :  { %2475 = vmatpush.bf16.msra.mxu3 %v4018_v50  ;;  %2433 = vmatpush.bf16.msra.mxu0 %v2962_v51  ;;  %v3799_v50 = vld [vmem:[%s6962_s1 + $0x71c] sm:$0xf0]  ;;  %v3450_v51 = vor.u32 %v4412_v43, %v3447_v44  ;;  %v3667_v32 = vld [vmem:[%s6962_s1 + $0x614] sm:$0xf0]  ;;  %v4616_v37 = vld [vmem:[%s6962_s1 + $0xa90] sm:$0xf0] }
  0x99   :  { %2461 = vmatpush.bf16.msra.mxu2 %v3666_v54  ;;  %v3051_v54 = vld [vmem:[%s6962_s1 + $0x144] sm:$0xf0]  ;;  %v3670_v42 = vor.u32 %v4467_v31, %v3667_v32  ;;  %v4352_v43 = vld [vmem:[%s6962_s1 + $0x250] sm:$0xf0]  ;;  %v3937_v44 = vld [vmem:[%s6962_s1 + $0x800] sm:$0xf] }
  0x9a   :  { %v3054_v61 = vor.u32 %v4313_v53, %v3051_v54  ;;  %v3189_v41 = vld [vmem:[%s6962_s1 + $0x228] sm:$0xf]  ;;  %v4539_v45 = vld [vmem:[%s6962_s1 + $0x828] sm:$0xf0]  ;;  %v4440_v55 = vld [vmem:[%s6962_s1 + $0x510] sm:$0xf0] }
  0x9b   :  { %2447 = vmatpush.bf16.msra.mxu1 %v3314_v59  ;;  %v3802_v59 = vor.u32 %v4500_v49, %v3799_v50  ;;  %v3938_v53 = vor.u32 %v4539_v45, %v3937_v44  ;;  %v3541_v54 = vld [vmem:[%s6962_s1 + $0x4e8] sm:$0xf]  ;;  %v3145_v56 = vld [vmem:[%s6962_s1 + $0x1d0] sm:$0xf]  ;;  %v4341_v58 = vld [vmem:[%s6962_s1 + $0x1f8] sm:$0xf0] }
  0x9c   :  { %2476 = vmatpush.bf16.msra.mxu3 %v3974_v2  ;;  %2434 = vmatpush.bf16.msra.mxu0 %v2918_v3  ;;  %v4302_v2 = vld [vmem:[%s6962_s1 + $0xc4] sm:$0xf]  ;;  %v3007_v3 = vld [vmem:[%s6962_s1 + $0xec] sm:$0xf0]  ;;  %v3542_v63 = vor.u32 %v4440_v55, %v3541_v54  ;;  %v3146_v4 = vor.u32 %v4341_v58, %v3145_v56  ;;  %v4396_v54 = vld [vmem:[%s6962_s1 + $0x3b0] sm:$0xf0] }
  0x9d   :  { %2462 = vmatpush.bf16.msra.mxu2 %v3622_v7  ;;  %v4019_v7 = vld [vmem:[%s6962_s1 + $0x8d4] sm:$0xf0]  ;;  %v3010_v9 = vor.u32 %v4302_v2, %v3007_v3  ;;  %v4594_v17 = vld [vmem:[%s6962_s1 + $0x9e0] sm:$0xf0]  ;;  %v2969_v55 = vld [vmem:[%s6962_s1 + $0x70] sm:$0xf] }
  0x9e   :  { %v5968_v31 = vld [vmem:[%s6963_s2] sm:$0xff]  ;;  %v4297_v56 = vld [vmem:[%s6962_s1 + $0x98] sm:$0xf0]  ;;  %v4484_v58 = vld [vmem:[%s6962_s1 + $0x670] sm:$0xf0]  ;;  %vm2838_vm3 = vcmask 1042432  }
  0x9f   :  { %2448 = vmatpush.bf16.msra.mxu1 %v3270_v16  ;;  %4267 = vmatmul.msk.bf16.vlgmr.msra.gmra.mxu3 %vm2162_vm2, %v4921_v60  ;;  %v2963_v16 = vld [vmem:[%s6962_s1 + $0x94] sm:$0xf0]  ;;  %vm2839_vm4 = vsmask.f32 2304  ;;  %vm2841_vm5 = vcmask 1046532   ;;  %vm2836_vm10 = vcmask 322560  }
  0xa0   :  { %2483 = vmatpush.bf16.msrb.mxu3 %v3230_v6  ;;  %2497 = vmatpush.bf16.msrb.mxu0 %v3582_v10  ;;  %v4555_v6 = vld [vmem:[%s6962_s1 + $0x8ac] sm:$0xf]  ;;  %vm2842_vm6 = vsmask.f32 6400  ;;  %vm6168_vm7 = vmand %vm2838_vm3, %vm2839_vm4  ;;  %vm2860_vm11 = vcmask 321536   ;;  %s2871_s7 = sshll.u32 %s6964_s3, 4  ;;  %s2872_s7 = int_to_ptr.hbm [resolvable:$true] %s2871_s7 }
  0xa1   :  { %2526 = vmatpush.bf16.msrb.mxu2 %v2186_v12  ;;  %2435 = vmatmul.bf16.vlgmr.msra.gmra.mxu0 %v4972_v18  ;;  %v4291_v10 = vld [vmem:[%s6962_s1 + $0x6c] sm:$0xf]  ;;  %v4478_v12 = vld [vmem:[%s6962_s1 + $0x644] sm:$0xf]  ;;  %v4022_v15 = vor.u32 %v4555_v6, %v4019_v7  ;;  %v3497_v6 = vld [vmem:[%s6962_s1 + $0x490] sm:$0xf] }
  0xa2   :  { %2463 = vmatmul.bf16.vlgmr.msra.gmra.mxu2 %v4955_v11  ;;  %2449 = vmatmul.bf16.vlgmr.msra.gmra.mxu1 %v4997_v30  ;;  %v3714_v24 = vor.u32 %v4478_v12, %v3711_v13  ;;  %v2966_v28 = vor.u32 %v4291_v10, %v2963_v16  ;;  %v5912_v2 = vpop.f32.mrf.mxu0  ;;  %v4429_v7 = vld [vmem:[%s6962_s1 + $0x4b8] sm:$0xf0]  ;;  %v3849_v10 = vld [vmem:[%s6962_s1 + $0x750] sm:$0xf]  ;;  %v4157_v16 = vld [vmem:[%s6962_s1 + $0x9b8] sm:$0xf] }
  0xa3   :  { %2511 = vmatpush.bf16.msrb.mxu1 %v3934_v22  ;;  %v3975_v22 = vld [vmem:[%s6962_s1 + $0x87c] sm:$0xf0]  ;;  %v4517_v12 = vld [vmem:[%s6962_s1 + $0x778] sm:$0xf0]  ;;  %v5935_v13 = vpop.f32.mrf.mxu1  ;;  %vm6175_vm8 = vmand %vm2841_vm5, %vm2842_vm6  ;;  %s4652_s8 = smov 704   ;;  %s4653_s9 = smov 44  }
  0xa4   :  { %2484 = vmatpush.bf16.msrb.mxu3 %v3186_v23  ;;  %2498 = vmatpush.bf16.msrb.mxu0 %v3538_v26  ;;  %v3233_v23 = vld [vmem:[%s6962_s1 + $0x280] sm:$0xf]  ;;  %v4280_v26 = vld [vmem:[%s6962_s1 + $0x14] sm:$0xf]  ;;  %v3978_v34 = vor.u32 %v4544_v21, %v3975_v22  ;;  %v3850_v22 = vor.u32 %v4517_v12, %v3849_v10  ;;  %v3673_v10 = vld [vmem:[%s6962_s1 + $0x5f0] sm:$0xf] }
  0xa5   :  { %2527 = vmatpush.bf16.msrb.mxu2 %v4198_v27  ;;  %v2919_v27 = vld [vmem:[%s6962_s1 + $0x3c] sm:$0xf0]  ;;  %v3234_v38 = vor.u32 %v4363_v25, %v3233_v23  ;;  %v3453_v23 = vld [vmem:[%s6962_s1 + $0x438] sm:$0xf]  ;;  %v4473_v12 = vld [vmem:[%s6962_s1 + $0x618] sm:$0xf0] }
  0xa6   :  { %v2922_v46 = vor.u32 %v4280_v26, %v2919_v27  ;;  %v5914_v3 = vpop.f32.mrf.mxu3  ;;  %v3057_v25 = vld [vmem:[%s6962_s1 + $0x120] sm:$0xf]  ;;  %v4319_v26 = vld [vmem:[%s6962_s1 + $0x148] sm:$0xf0]  ;;  %v3805_v27 = vld [vmem:[%s6962_s1 + $0x6f8] sm:$0xf] }
  0xa7   :  { %2512 = vmatpush.bf16.msrb.mxu1 %v3890_v35  ;;  %v4451_v35 = vld [vmem:[%s6962_s1 + $0x568] sm:$0xf0]  ;;  %vm6210_vm9 = vmor %vm6175_vm8, %vm6168_vm7 }
  0xa8   :  { %2485 = vmatpush.bf16.msrb.mxu3 %v3142_v36  ;;  %2499 = vmatpush.bf16.msrb.mxu0 %v3494_v39  ;;  %v4245_v36 = vld [vmem:[%s6962_s1 + $0xa68] sm:$0xf]  ;;  %v4368_v39 = vld [vmem:[%s6962_s1 + $0x2d4] sm:$0xf]  ;;  %v3586_v50 = vor.u32 %v4451_v35, %v3585_v29  ;;  %v4158_v29 = vor.u32 %v4594_v17, %v4157_v16  ;;  %v3058_v35 = vor.u32 %v4319_v26, %v3057_v25  ;;  %v3981_v26 = vld [vmem:[%s6962_s1 + $0x858] sm:$0xf] }
  0xa9   :  { %2528 = vmatpush.bf16.msrb.mxu2 %v4154_v40  ;;  %v3271_v40 = vld [vmem:[%s6962_s1 + $0x2fc] sm:$0xf0]  ;;  %v4246_v49 = vor.u32 %v4616_v37, %v4245_v36  ;;  %v5944_v20 = vpop.f32.mrf.mxu2  ;;  %vm2861_vm12 = vmand %vm2860_vm11, %vm2839_vm4 }
  0xaa   :  { %v3409_v37 = vld [vmem:[%s6962_s1 + $0x3e0] sm:$0xf]  ;;  %v5995_v44 = vpop.f32.mrf.mxu0 }
  0xab   :  { %2513 = vmatpush.bf16.msrb.mxu1 %v3846_v47  ;;  %v4456_v47 = vld [vmem:[%s6962_s1 + $0x594] sm:$0xf]  ;;  %v2189_v62 = vand.u32 %v4246_v49, %v4710_v19 }
  0xac   :  { %2486 = vmatpush.bf16.msrb.mxu3 %v3098_v48  ;;  %2500 = vmatpush.bf16.msrb.mxu0 %v3450_v51  ;;  %v3623_v48 = vld [vmem:[%s6962_s1 + $0x5bc] sm:$0xf0]  ;;  %v3274_v51 = vor.u32 %v4368_v39, %v3271_v40  ;;  %v3013_v39 = vld [vmem:[%s6962_s1 + $0xc8] sm:$0xf]  ;;  %v4308_v40 = vld [vmem:[%s6962_s1 + $0xf0] sm:$0xf0] }
  0xad   :  { %2529 = vmatpush.bf16.msrb.mxu2 %v4110_v52  ;;  %v3190_v52 = vor.u32 %v4352_v43, %v3189_v41  ;;  %v3626_v57 = vor.u32 %v4456_v47, %v3623_v48  ;;  %v3761_v41 = vld [vmem:[%s6962_s1 + $0x6a0] sm:$0xf]  ;;  %v396_v43 = vperm.slane %v5968_v31, 0  ;;  %v4069_v48 = vld [vmem:[%s6962_s1 + $0x908] sm:$0xf] }
  0xae   :  { %v5997_v45 = vpop.f32.mrf.mxu3  ;;  %v4572_v49 = vld [vmem:[%s6962_s1 + $0x930] sm:$0xf0] }
  0xaf   :  { %2514 = vmatpush.bf16.msrb.mxu1 %v3802_v59  ;;  %v3893_v59 = vld [vmem:[%s6962_s1 + $0x7a8] sm:$0xf] }
  0xb0   :  { %2487 = vmatpush.bf16.msrb.mxu3 %v3054_v61  ;;  %2501 = vmatpush.bf16.msrb.mxu0 %v3406_v0  ;;  %v4528_v61 = vld [vmem:[%s6962_s1 + $0x7d0] sm:$0xf0]  ;;  %v4201_v0 = vld [vmem:[%s6962_s1 + $0xa10] sm:$0xf] }
  0xb1   :  { %2530 = vmatpush.bf16.msrb.mxu2 %v4066_v1  ;;  %v4605_v1 = vld [vmem:[%s6962_s1 + $0xa38] sm:$0xf0]  ;;  %v3894_v5 = vor.u32 %v4528_v61, %v3893_v59  ;;  %v2213_v59 = vadd.f32 %v5912_v2, %v396_v43  ;;  %v6028_v61 = vpop.f32.mrf.mxu2  ;;  %v4025_v2 = vld [vmem:[%s6962_s1 + $0x8b0] sm:$0xf] }
  0xb3   :  { %2515 = vmatpush.bf16.msrb.mxu1 %v3758_v8  ;;  %v3101_v8 = vld [vmem:[%s6962_s1 + $0x178] sm:$0xf]  ;;  %v2227_v16 = vadd.f32 %v5935_v13, %v2213_v59  ;;  %v4374_v13 = vld [vmem:[%s6962_s1 + $0x300] sm:$0xf0]  ;;  %v4424_v59 = vld [vmem:[%s6962_s1 + $0x494] sm:$0xf] }
  0xb4   :  { %2488 = vmatpush.bf16.msrb.mxu3 %v3010_v9  ;;  %2502 = vmatpush.bf16.msrb.mxu0 %v3362_v14  ;;  %v4330_v9 = vld [vmem:[%s6962_s1 + $0x1a0] sm:$0xf0]  ;;  %v4202_v14 = vor.u32 %v4605_v1, %v4201_v0  ;;  %v3321_v0 = vld [vmem:[%s6962_s1 + $0x330] sm:$0xf] }
  0xb5   :  { %2531 = vmatpush.bf16.msrb.mxu2 %v4022_v15  ;;  %v3498_v15 = vor.u32 %v4429_v7, %v3497_v6  ;;  %v3102_v21 = vor.u32 %v4330_v9, %v3101_v8  ;;  %v2970_v6 = vor.u32 %v4297_v56, %v2969_v55  ;;  %v2925_v8 = vld [vmem:[%s6962_s1 + $0x18] sm:$0xf]  ;;  %v4286_v9 = vld [vmem:[%s6962_s1 + $0x40] sm:$0xf0] }
  0xb6   :  { %v3895_v56 = vld [vmem:[%s6962_s1 + $0x7d4] sm:$0xf0] }
  0xb7   :  { %2516 = vmatpush.bf16.msrb.mxu1 %v3714_v24  ;;  %v4418_v24 = vld [vmem:[%s6962_s1 + $0x460] sm:$0xf0] }
  0xb8   :  { %2489 = vmatpush.bf16.msrb.mxu3 %v2966_v28  ;;  %2503 = vmatpush.bf16.msrb.mxu0 %v3318_v33  ;;  %v4506_v28 = vld [vmem:[%s6962_s1 + $0x720] sm:$0xf0]  ;;  %v3454_v32 = vor.u32 %v4418_v24, %v3453_v23  ;;  %v4113_v33 = vld [vmem:[%s6962_s1 + $0x960] sm:$0xf]  ;;  %v4611_v23 = vld [vmem:[%s6962_s1 + $0xa6c] sm:$0xf] }
  0xb9   :  { %2532 = vmatpush.bf16.msrb.mxu2 %v3978_v34  ;;  %v4583_v34 = vld [vmem:[%s6962_s1 + $0x988] sm:$0xf0]  ;;  %v3806_v36 = vor.u32 %v4506_v28, %v3805_v27  ;;  %v4247_v24 = vld [vmem:[%s6962_s1 + $0xa94] sm:$0xf0]  ;;  %v4550_v27 = vld [vmem:[%s6962_s1 + $0x880] sm:$0xf0] }
  0xbb   :  { %2517 = vmatpush.bf16.msrb.mxu1 %v3670_v42  ;;  %v4495_v42 = vld [vmem:[%s6962_s1 + $0x6c8] sm:$0xf0] }
  0xbc   :  { %2490 = vmatpush.bf16.msrb.mxu3 %v2922_v46  ;;  %4268 = vmatmul.msk.bf16.vlgmr.msrb.gmra.mxu2 %vm2162_vm2, %v4921_v60  ;;  %v4114_v46 = vor.u32 %v4583_v34, %v4113_v33  ;;  %v3674_v33 = vor.u32 %v4473_v12, %v3673_v10  ;;  %v4534_v34 = vld [vmem:[%s6962_s1 + $0x804] sm:$0xf]  ;;  %v4512_v12 = vld [vmem:[%s6962_s1 + $0x754] sm:$0xf] }
  0xbd   :  { %2539 = vmatpush.bf16.msra.mxu2 %v3234_v38  ;;  %2504 = vmatpush.bf16.msrb.mxu0 %v3274_v51  ;;  %v4407_v38 = vld [vmem:[%s6962_s1 + $0x408] sm:$0xf0]  ;;  %v3014_v51 = vor.u32 %v4308_v40, %v3013_v39  ;;  %v3939_v39 = vld [vmem:[%s6962_s1 + $0x82c] sm:$0xf0]  ;;  %v3629_v40 = vld [vmem:[%s6962_s1 + $0x598] sm:$0xf] }
  0xbe   :  { %v3410_v47 = vor.u32 %v4407_v38, %v3409_v37 }
  0xbf   :  { %2491 = vmatmul.bf16.vlgmr.msrb.gmra.mxu3 %v4972_v18  ;;  %2518 = vmatpush.bf16.msrb.mxu1 %v3626_v57  ;;  %v3717_v57 = vld [vmem:[%s6962_s1 + $0x648] sm:$0xf] }
  0xc0   :  { %2553 = vmatpush.bf16.msra.mxu3 %v3586_v50  ;;  %2505 = vmatmul.bf16.vlgmr.msrb.gmra.mxu0 %v4997_v30  ;;  %v6005_v50 = vpop.f32.mrf.mxu1  ;;  %v3718_v7 = vor.u32 %v4484_v58, %v3717_v57  ;;  %v3942_v57 = vor.u32 %v4534_v34, %v3939_v39 }
  0xc1   :  { %2540 = vmatpush.bf16.msra.mxu2 %v3190_v52  ;;  %2567 = vmatpush.bf16.msra.mxu0 %v3938_v53  ;;  %v3762_v52 = vor.u32 %v4495_v42, %v3761_v41  ;;  %v3365_v53 = vld [vmem:[%s6962_s1 + $0x388] sm:$0xf]  ;;  %v4462_v41 = vld [vmem:[%s6962_s1 + $0x5c0] sm:$0xf0]  ;;  %v4250_v42 = vor.u32 %v4611_v23, %v4247_v24  ;;  %v4413_v24 = vld [vmem:[%s6962_s1 + $0x43c] sm:$0xf] }
  0xc2   :  { %2519 = vmatmul.bf16.vlgmr.msrb.gmra.mxu1 %v4955_v11  ;;  %v3366_v1 = vor.u32 %v4396_v54, %v3365_v53  ;;  %v2282_v17 = vpop.f32.mrf.mxu0  ;;  %v3630_v58 = vor.u32 %v4462_v41, %v3629_v40  ;;  %v4501_v40 = vld [vmem:[%s6962_s1 + $0x6fc] sm:$0xf]  ;;  %v3807_v41 = vld [vmem:[%s6962_s1 + $0x724] sm:$0xf0] }
  0xc3   :  { %2582 = vmatpush.bf16.msra.mxu1 %v2189_v62  ;;  %v397_v62 = vperm.slane %v5968_v31, 1 }
  0xc4   :  { %2554 = vmatpush.bf16.msra.mxu3 %v3542_v63  ;;  %v4070_v63 = vor.u32 %v4572_v49, %v4069_v48  ;;  %v3982_v48 = vor.u32 %v4550_v27, %v3981_v26  ;;  %v4435_v49 = vld [vmem:[%s6962_s1 + $0x4ec] sm:$0xf]  ;;  %v4589_v26 = vld [vmem:[%s6962_s1 + $0x9bc] sm:$0xf] }
  0xc5   :  { %2541 = vmatpush.bf16.msra.mxu2 %v3146_v4  ;;  %2568 = vmatpush.bf16.msra.mxu0 %v3894_v5  ;;  %v4385_v4 = vld [vmem:[%s6962_s1 + $0x358] sm:$0xf0] }
  0xc6   :  { %v4561_v5 = vld [vmem:[%s6962_s1 + $0x8d8] sm:$0xf0]  ;;  %v3322_v25 = vor.u32 %v4385_v4, %v3321_v0  ;;  %v2268_v28 = vpop.f32.mrf.mxu3  ;;  %v3499_v4 = vld [vmem:[%s6962_s1 + $0x4bc] sm:$0xf0] }
  0xc7   :  { %2583 = vmatpush.bf16.msra.mxu1 %v4202_v14  ;;  %v4446_v14 = vld [vmem:[%s6962_s1 + $0x544] sm:$0xf]  ;;  %v2269_v37 = vadd.f32 %v2268_v28, %v397_v62 }
  0xc8   :  { %2555 = vmatpush.bf16.msra.mxu3 %v3498_v15  ;;  %v3587_v15 = vld [vmem:[%s6962_s1 + $0x56c] sm:$0xf0] }
  0xc9   :  { %2542 = vmatpush.bf16.msra.mxu2 %v3102_v21  ;;  %2569 = vmatpush.bf16.msra.mxu0 %v3850_v22  ;;  %v4026_v21 = vor.u32 %v4561_v5, %v4025_v2  ;;  %v3277_v22 = vld [vmem:[%s6962_s1 + $0x2d8] sm:$0xf]  ;;  %v3590_v38 = vor.u32 %v4446_v14, %v3587_v15  ;;  %v2283_v53 = vadd.f32 %v2282_v17, %v2269_v37  ;;  %v4600_v2 = vld [vmem:[%s6962_s1 + $0xa14] sm:$0xf]  ;;  %v4203_v5 = vld [vmem:[%s6962_s1 + $0xa3c] sm:$0xf0] }
  0xca   :  { %v3278_v54 = vor.u32 %v4374_v13, %v3277_v22  ;;  %v3851_v14 = vld [vmem:[%s6962_s1 + $0x77c] sm:$0xf0]  ;;  %v4206_v17 = vor.u32 %v4600_v2, %v4203_v5  ;;  %v3455_v13 = vld [vmem:[%s6962_s1 + $0x464] sm:$0xf0] }
  0xcb   :  { %2584 = vmatpush.bf16.msra.mxu1 %v4158_v29  ;;  %v2296_v29 = vpop.f32.mrf.mxu1 }
  0xcc   :  { %2556 = vmatpush.bf16.msra.mxu3 %v3454_v32  ;;  %v2926_v32 = vor.u32 %v4286_v9, %v2925_v8 }
  0xcd   :  { %2543 = vmatpush.bf16.msra.mxu2 %v3058_v35  ;;  %2570 = vmatpush.bf16.msra.mxu0 %v3806_v36  ;;  %v4358_v35 = vld [vmem:[%s6962_s1 + $0x284] sm:$0xf]  ;;  %v3235_v36 = vld [vmem:[%s6962_s1 + $0x2ac] sm:$0xf0] }
  0xce   :  { %v3238_v55 = vor.u32 %v4358_v35, %v3235_v36  ;;  %v2270_v15 = vpop.f32.mrf.mxu3  ;;  %v4325_v35 = vld [vmem:[%s6962_s1 + $0x17c] sm:$0xf]  ;;  %v3103_v36 = vld [vmem:[%s6962_s1 + $0x1a4] sm:$0xf0] }
  0xcf   :  { %2585 = vmatpush.bf16.msra.mxu1 %v4114_v46  ;;  %v2241_v46 = vadd.f32 %v5944_v20, %v2227_v16  ;;  %v4523_v20 = vld [vmem:[%s6962_s1 + $0x7ac] sm:$0xf]  ;;  %v3502_v16 = vor.u32 %v4424_v59, %v3499_v4  ;;  %v2271_v23 = vadd.f32 %v2270_v15, %v397_v62  ;;  %v4159_v62 = vld [vmem:[%s6962_s1 + $0x9e4] sm:$0xf0]  ;;  %v4556_v15 = vld [vmem:[%s6962_s1 + $0x8b4] sm:$0xf] }
  0xd0   :  { %2557 = vmatpush.bf16.msra.mxu3 %v3410_v47  ;;  %v2310_v47 = vpop.f32.mrf.mxu2  ;;  %v4162_v39 = vor.u32 %v4589_v26, %v4159_v62  ;;  %v4391_v59 = vld [vmem:[%s6962_s1 + $0x38c] sm:$0xf]  ;;  %v3279_v62 = vld [vmem:[%s6962_s1 + $0x304] sm:$0xf0] }
  0xd1   :  { %2544 = vmatpush.bf16.msra.mxu2 %v3014_v51  ;;  %2571 = vmatpush.bf16.msra.mxu0 %v3762_v52  ;;  %v3543_v51 = vld [vmem:[%s6962_s1 + $0x514] sm:$0xf0]  ;;  %v2215_v52 = vadd.f32 %v5995_v44, %v396_v43  ;;  %v4347_v43 = vld [vmem:[%s6962_s1 + $0x22c] sm:$0xf] }
  0xd2   :  { %v3191_v44 = vld [vmem:[%s6962_s1 + $0x254] sm:$0xf0]  ;;  %v3546_v0 = vor.u32 %v4435_v49, %v3543_v51 }
  0xd3   :  { %2586 = vmatpush.bf16.msra.mxu1 %v4070_v63  ;;  %v2297_v63 = vadd.f32 %v2296_v29, %v2283_v53  ;;  %v2229_v8 = vadd.f32 %v6005_v50, %v2215_v52  ;;  %v3194_v10 = vor.u32 %v4347_v43, %v3191_v44  ;;  %v2284_v50 = vpop.f32.mrf.mxu0  ;;  %v2845_v52 = vld [vmem:[#allocation2 + $0x2c] sm:$0x77]  ;;  %v3106_v53 = vor.u32 %v4325_v35, %v3103_v36  ;;  %v4490_v43 = vld [vmem:[%s6962_s1 + $0x6a4] sm:$0xf]  ;;  %v3241_v29 = vld [vmem:[%s6962_s1 + $0x288] sm:$0xf] }
  0xd4   :  { %2558 = vmatpush.bf16.msra.mxu3 %v3366_v1  ;;  %v2192_v1 = vand.u32 %v4250_v42, %v4710_v19  ;;  %v2285_v28 = vadd.f32 %v2284_v50, %v2271_v23  ;;  %v4402_v42 = vld [vmem:[%s6962_s1 + $0x3e4] sm:$0xf]  ;;  %v3763_v44 = vld [vmem:[%s6962_s1 + $0x6cc] sm:$0xf0]  ;;  %v4027_v50 = vld [vmem:[%s6962_s1 + $0x8dc] sm:$0xf0] }
  0xd5   :  { %2545 = vmatpush.bf16.msra.mxu2 %v2970_v6  ;;  %2572 = vmatpush.bf16.msra.mxu0 %v3718_v7  ;;  %v2255_v6 = vadd.f32 %v5914_v3, %v2241_v46  ;;  %v3898_v7 = vor.u32 %v4523_v20, %v3895_v56  ;;  %v2311_v9 = vadd.f32 %v2310_v47, %v2297_v63  ;;  %v4336_v3 = vld [vmem:[%s6962_s1 + $0x1d4] sm:$0xf]  ;;  %v3411_v46 = vld [vmem:[%s6962_s1 + $0x40c] sm:$0xf0]  ;;  %v4578_v47 = vld [vmem:[%s6962_s1 + $0x964] sm:$0xf] }
  0xd6   :  { %v2243_v27 = vadd.f32 %v6028_v61, %v2229_v8  ;;  %v3854_v61 = vor.u32 %v4512_v12, %v3851_v14  ;;  %v4314_v20 = vld [vmem:[%s6962_s1 + $0x124] sm:$0xf]  ;;  %v3367_v63 = vld [vmem:[%s6962_s1 + $0x3b4] sm:$0xf0]  ;;  %v3766_v5 = vor.u32 %v4490_v43, %v3763_v44  ;;  %v4380_v14 = vld [vmem:[%s6962_s1 + $0x334] sm:$0xf]  ;;  %v4030_v26 = vor.u32 %v4556_v15, %v4027_v50 }
  0xd7   :  { %2587 = vmatpush.bf16.msra.mxu1 %v4026_v21  ;;  %v3147_v21 = vld [vmem:[%s6962_s1 + $0x1fc] sm:$0xf0]  ;;  %v2819_v22 = vpack.c.bf16 %v2311_v9, %v2255_v6  ;;  %v4303_v6 = vld [vmem:[%s6962_s1 + $0xcc] sm:$0xf]  ;;  %v3370_v8 = vor.u32 %v4391_v59, %v3367_v63  ;;  %v3719_v12 = vld [vmem:[%s6962_s1 + $0x674] sm:$0xf0] }
  0xd8   :  { %2559 = vmatpush.bf16.msra.mxu3 %v3322_v25  ;;  %v2298_v25 = vpop.f32.mrf.mxu1  ;;  %v2257_v49 = vadd.f32 %v5997_v45, %v2243_v27  ;;  %v3059_v45 = vld [vmem:[%s6962_s1 + $0x14c] sm:$0xf0]  ;;  %v4292_v23 = vld [vmem:[%s6962_s1 + $0x74] sm:$0xf]  ;;  %v4545_v27 = vld [vmem:[%s6962_s1 + $0x85c] sm:$0xf] }
  0xd9   :  { %2546 = vmatpush.bf16.msra.mxu2 %v2926_v32  ;;  %2573 = vmatpush.bf16.msra.mxu0 %v3674_v33  ;;  %2831 = vst [vmem:[#allocation2] sm:$0xff] %v2819_v22  ;;  %v3150_v32 = vor.u32 %v4336_v3, %v3147_v21  ;;  %v2312_v33 = vpop.f32.mrf.mxu2  ;;  %v2299_v37 = vadd.f32 %v2298_v25, %v2285_v28  ;;  %v3323_v3 = vld [vmem:[%s6962_s1 + $0x35c] sm:$0xf0]  ;;  %v4369_v25 = vld [vmem:[%s6962_s1 + $0x2dc] sm:$0xf] }
  0xda   :  { %v3062_v2 = vor.u32 %v4314_v20, %v3059_v45  ;;  %v3675_v21 = vld [vmem:[%s6962_s1 + $0x61c] sm:$0xf0]  ;;  %v3983_v28 = vld [vmem:[%s6962_s1 + $0x884] sm:$0xf0]  ;;  %v4540_v36 = vld [vmem:[%s6962_s1 + $0x830] sm:$0xf0] }
  0xdb   :  { %2588 = vmatpush.bf16.msra.mxu1 %v3982_v48  ;;  %v4115_v48 = vld [vmem:[%s6962_s1 + $0x98c] sm:$0xf0]  ;;  %v2313_v51 = vadd.f32 %v2312_v33, %v2299_v37  ;;  %v4617_v33 = vld [vmem:[%s6962_s1 + $0xa98] sm:$0xf0]  ;;  %v3945_v35 = vld [vmem:[%s6962_s1 + $0x808] sm:$0xf] }
  0xdc   :  { %2560 = vmatpush.bf16.msra.mxu3 %v3278_v54  ;;  %2547 = vmatmul.bf16.vlgmr.msra.gmra.mxu2 %v4972_v18  ;;  %v4353_v45 = vld [vmem:[%s6962_s1 + $0x258] sm:$0xf0]  ;;  %v4209_v59 = vld [vmem:[%s6962_s1 + $0xa18] sm:$0xf]  ;;  %v4606_v63 = vld [vmem:[%s6962_s1 + $0xa40] sm:$0xf0] }
  0xdd   :  { %2609 = vmatpush.bf16.msrb.mxu2 %v3590_v38  ;;  %2574 = vmatpush.bf16.msra.mxu0 %v3630_v58  ;;  %v3458_v38 = vor.u32 %v4413_v24, %v3455_v13  ;;  %v2825_v56 = vpack.c.bf16 %v2313_v51, %v2257_v49  ;;  %v4118_v58 = vor.u32 %v4578_v47, %v4115_v48  ;;  %v2971_v24 = vld [vmem:[%s6962_s1 + $0x9c] sm:$0xf0]  ;;  %v3197_v51 = vld [vmem:[%s6962_s1 + $0x230] sm:$0xf]  ;;  %v4595_v15 = vld [vmem:[%s6962_s1 + $0x9e8] sm:$0xf0] }
  0xde   :  { %4269 = vmatmul.msk.bf16.vlgmr.msra.gmra.mxu1 %vm2162_vm2, %v4921_v60  ;;  %v3326_v13 = vor.u32 %v4380_v14, %v3323_v3  ;;  %v2974_v34 = vor.u32 %v4292_v23, %v2971_v24  ;;  %v3946_v49 = vor.u32 %v4540_v36, %v3945_v35  ;;  %v4165_v3 = vld [vmem:[%s6962_s1 + $0x9c0] sm:$0xf]  ;;  %v4430_v23 = vld [vmem:[%s6962_s1 + $0x4c0] sm:$0xf0]  ;;  %v4331_v24 = vld [vmem:[%s6962_s1 + $0x1a8] sm:$0xf0] }
  0xdf   :  { %2595 = vmatpush.bf16.msrb.mxu1 %v3238_v55  ;;  %2561 = vmatmul.bf16.vlgmr.msra.gmra.mxu3 %v4997_v30  ;;  %v3810_v55 = vor.u32 %v4501_v40, %v3807_v41  ;;  %v2846_v4 = vsel %vm6210_vm9, %v2825_v56, %v2845_v52  ;;  %v3282_v40 = vor.u32 %v4369_v25, %v3279_v62  ;;  %v3593_v52 = vld [vmem:[%s6962_s1 + $0x548] sm:$0xf]  ;;  %v3901_v56 = vld [vmem:[%s6962_s1 + $0x7b0] sm:$0xf]  ;;  %v3813_v25 = vld [vmem:[%s6962_s1 + $0x700] sm:$0xf] }
  0xe0   :  { %2623 = vmatpush.bf16.msrb.mxu3 %v3942_v57  ;;  %2575 = vmatmul.bf16.vlgmr.msra.gmra.mxu0 %v4955_v11  ;;  %v3414_v57 = vor.u32 %v4402_v42, %v3411_v46  ;;  %2847 = vst [vmem:[#allocation2 + $0x2c] sm:$0x77] %v2846_v4  ;;  %v3986_v41 = vor.u32 %v4545_v27, %v3983_v28  ;;  %v4457_v42 = vld [vmem:[%s6962_s1 + $0x59c] sm:$0xf]  ;;  %v3631_v46 = vld [vmem:[%s6962_s1 + $0x5c4] sm:$0xf0] }
  0xe1   :  { %2610 = vmatpush.bf16.msrb.mxu2 %v3546_v0  ;;  %2638 = vmatpush.bf16.msrb.mxu0 %v2192_v1  ;;  %v4567_v0 = vld [vmem:[%s6962_s1 + $0x90c] sm:$0xf]  ;;  %v4071_v1 = vld [vmem:[%s6962_s1 + $0x934] sm:$0xf0]  ;;  %v4121_v28 = vld [vmem:[%s6962_s1 + $0x968] sm:$0xf] }
  0xe2   :  { %v4074_v9 = vor.u32 %v4567_v0, %v4071_v1  ;;  %v3198_v0 = vor.u32 %v4353_v45, %v3197_v51  ;;  %v3153_v4 = vld [vmem:[%s6962_s1 + $0x1d8] sm:$0xf]  ;;  %v4419_v35 = vld [vmem:[%s6962_s1 + $0x468] sm:$0xf0]  ;;  %v4320_v36 = vld [vmem:[%s6962_s1 + $0x150] sm:$0xf0] }
  0xe3   :  { %2596 = vmatpush.bf16.msrb.mxu1 %v3194_v10  ;;  %v4479_v10 = vld [vmem:[%s6962_s1 + $0x64c] sm:$0xf]  ;;  %v4309_v45 = vld [vmem:[%s6962_s1 + $0xf8] sm:$0xf0] }
  0xe4   :  { %2624 = vmatpush.bf16.msrb.mxu3 %v3898_v7  ;;  %v3015_v7 = vld [vmem:[%s6962_s1 + $0xf4] sm:$0xf0]  ;;  %v3722_v22 = vor.u32 %v4479_v10, %v3719_v12  ;;  %v6366_v10 = vpop.f32.mrf.mxu0  ;;  %v4210_v12 = vor.u32 %v4606_v63, %v4209_v59 }
  0xe5   :  { %2611 = vmatpush.bf16.msrb.mxu2 %v3502_v16  ;;  %2639 = vmatpush.bf16.msrb.mxu0 %v4206_v17  ;;  %v3018_v16 = vor.u32 %v4303_v6, %v3015_v7  ;;  %v4468_v17 = vld [vmem:[%s6962_s1 + $0x5f4] sm:$0xf]  ;;  %v6354_v6 = vpop.f32.mrf.mxu2  ;;  %v4342_v7 = vld [vmem:[%s6962_s1 + $0x200] sm:$0xf0] }
  0xe6   :  { %v3678_v37 = vor.u32 %v4468_v17, %v3675_v21  ;;  %v6374_v50 = vpop.f32.mrf.mxu3  ;;  %v3109_v21 = vld [vmem:[%s6962_s1 + $0x180] sm:$0xf] }
  0xe7   :  { %2597 = vmatpush.bf16.msrb.mxu1 %v3150_v32  ;;  %v4253_v32 = vld [vmem:[%s6962_s1 + $0xa70] sm:$0xf] }
  0xe8   :  { %2625 = vmatpush.bf16.msrb.mxu3 %v3854_v61  ;;  %v4364_v61 = vld [vmem:[%s6962_s1 + $0x2b0] sm:$0xf0]  ;;  %v4254_v47 = vor.u32 %v4617_v33, %v4253_v32  ;;  %v3110_v32 = vor.u32 %v4331_v24, %v3109_v21 }
  0xe9   :  { %2612 = vmatpush.bf16.msrb.mxu2 %v3458_v38  ;;  %2640 = vmatpush.bf16.msrb.mxu0 %v4162_v39  ;;  %v4281_v38 = vld [vmem:[%s6962_s1 + $0x1c] sm:$0xf]  ;;  %v2927_v39 = vld [vmem:[%s6962_s1 + $0x44] sm:$0xf0]  ;;  %v3242_v48 = vor.u32 %v4364_v61, %v3241_v29  ;;  %v4584_v29 = vld [vmem:[%s6962_s1 + $0x990] sm:$0xf0] }
  0xea   :  { %v2930_v20 = vor.u32 %v4281_v38, %v2927_v39  ;;  %v2195_v43 = vand.u32 %v4254_v47, %v4710_v19  ;;  %v3461_v61 = vld [vmem:[%s6962_s1 + $0x440] sm:$0xf]  ;;  %v4496_v38 = vld [vmem:[%s6962_s1 + $0x6d0] sm:$0xf0]  ;;  %v398_v39 = vperm.slane %v5968_v31, 2 }
  0xeb   :  { %2598 = vmatpush.bf16.msrb.mxu1 %v3106_v53  ;;  %v4452_v53 = vld [vmem:[%s6962_s1 + $0x570] sm:$0xf0]  ;;  %v4573_v47 = vld [vmem:[%s6962_s1 + $0x938] sm:$0xf0] }
  0xec   :  { %2626 = vmatpush.bf16.msrb.mxu3 %v3810_v55  ;;  %v6327_v55 = vpop.f32.mrf.mxu1  ;;  %v3594_v44 = vor.u32 %v4452_v53, %v3593_v52  ;;  %v6433_v51 = vpop.f32.mrf.mxu0  ;;  %v3021_v52 = vld [vmem:[%s6962_s1 + $0xd0] sm:$0xf]  ;;  %v3417_v53 = vld [vmem:[%s6962_s1 + $0x3e8] sm:$0xf]  ;;  %v4612_v24 = vld [vmem:[%s6962_s1 + $0xa74] sm:$0xf] }
  0xed   :  { %2613 = vmatpush.bf16.msrb.mxu2 %v3414_v57  ;;  %2641 = vmatpush.bf16.msrb.mxu0 %v4118_v58  ;;  %v4529_v57 = vld [vmem:[%s6962_s1 + $0x7d8] sm:$0xf0]  ;;  %v3634_v58 = vor.u32 %v4457_v42, %v3631_v46  ;;  %v3462_v42 = vor.u32 %v4419_v35, %v3461_v61  ;;  %v4077_v46 = vld [vmem:[%s6962_s1 + $0x910] sm:$0xf] }
  0xee   :  { %v3902_v1 = vor.u32 %v4529_v57, %v3901_v56  ;;  %v3725_v56 = vld [vmem:[%s6962_s1 + $0x650] sm:$0xf]  ;;  %v4485_v57 = vld [vmem:[%s6962_s1 + $0x678] sm:$0xf0]  ;;  %v4078_v59 = vor.u32 %v4573_v47, %v4077_v46 }
  0xef   :  { %2599 = vmatpush.bf16.msrb.mxu1 %v3062_v2  ;;  %v3549_v2 = vld [vmem:[%s6962_s1 + $0x4f0] sm:$0xf] }
  0xf0   :  { %2627 = vmatpush.bf16.msrb.mxu3 %v3766_v5  ;;  %v4441_v5 = vld [vmem:[%s6962_s1 + $0x518] sm:$0xf0] }
  0xf1   :  { %2614 = vmatpush.bf16.msrb.mxu2 %v3370_v8  ;;  %2642 = vmatpush.bf16.msrb.mxu0 %v4074_v9  ;;  %v3857_v8 = vld [vmem:[%s6962_s1 + $0x758] sm:$0xf]  ;;  %v4518_v9 = vld [vmem:[%s6962_s1 + $0x780] sm:$0xf0]  ;;  %v3550_v14 = vor.u32 %v4441_v5, %v3549_v2  ;;  %v3726_v2 = vor.u32 %v4485_v57, %v3725_v56 }
  0xf2   :  { %v3858_v17 = vor.u32 %v4518_v9, %v3857_v8  ;;  %v2977_v5 = vld [vmem:[%s6962_s1 + $0x78] sm:$0xf]  ;;  %v4298_v9 = vld [vmem:[%s6962_s1 + $0xa0] sm:$0xf0] }
  0xf3   :  { %2600 = vmatpush.bf16.msrb.mxu1 %v3018_v16  ;;  %v3154_v16 = vor.u32 %v4342_v7, %v3153_v4  ;;  %v3022_v4 = vor.u32 %v4309_v45, %v3021_v52  ;;  %v4397_v7 = vld [vmem:[%s6962_s1 + $0x3b8] sm:$0xf0]  ;;  %v4375_v52 = vld [vmem:[%s6962_s1 + $0x308] sm:$0xf0] }
  0xf4   :  { %2628 = vmatpush.bf16.msrb.mxu3 %v3722_v22  ;;  %v3505_v22 = vld [vmem:[%s6962_s1 + $0x498] sm:$0xf]  ;;  %v6398_v62 = vpop.f32.mrf.mxu1 }
  0xf5   :  { %2615 = vmatpush.bf16.msrb.mxu2 %v3326_v13  ;;  %2643 = vmatpush.bf16.msrb.mxu0 %v4030_v26  ;;  %v4507_v13 = vld [vmem:[%s6962_s1 + $0x728] sm:$0xf0]  ;;  %v4166_v26 = vor.u32 %v4595_v15, %v4165_v3  ;;  %v3506_v27 = vor.u32 %v4430_v23, %v3505_v22  ;;  %v3989_v15 = vld [vmem:[%s6962_s1 + $0x860] sm:$0xf] }
  0xf6   :  { %v3814_v33 = vor.u32 %v4507_v13, %v3813_v25  ;;  %v4359_v23 = vld [vmem:[%s6962_s1 + $0x28c] sm:$0xf]  ;;  %v4255_v25 = vld [vmem:[%s6962_s1 + $0xa9c] sm:$0xf0]  ;;  %v2978_v13 = vor.u32 %v4298_v9, %v2977_v5 }
  0xf7   :  { %2601 = vmatpush.bf16.msrb.mxu1 %v2974_v34  ;;  %v3065_v34 = vld [vmem:[%s6962_s1 + $0x128] sm:$0xf]  ;;  %v3551_v5 = vld [vmem:[%s6962_s1 + $0x51c] sm:$0xf0] }
  0xf8   :  { %2629 = vmatpush.bf16.msrb.mxu3 %v3678_v37  ;;  %v3769_v37 = vld [vmem:[%s6962_s1 + $0x6a8] sm:$0xf] }
  0xf9   :  { %2616 = vmatpush.bf16.msrb.mxu2 %v3282_v40  ;;  %2644 = vmatpush.bf16.msrb.mxu0 %v3986_v41  ;;  %v6425_v40 = vpop.f32.mrf.mxu2  ;;  %v4122_v41 = vor.u32 %v4584_v29, %v4121_v28  ;;  %v4386_v28 = vld [vmem:[%s6962_s1 + $0x360] sm:$0xf0] }
  0xfa   :  { %v2327_v47 = vadd.f32 %v6425_v40, %v398_v39 }
  0xfb   :  { %2602 = vmatpush.bf16.msrb.mxu1 %v2930_v20  ;;  %v4408_v20 = vld [vmem:[%s6962_s1 + $0x410] sm:$0xf0] }
  0xfc   :  { %2630 = vmatpush.bf16.msrb.mxu3 %v3634_v58  ;;  %2617 = vmatmul.bf16.vlgmr.msrb.gmra.mxu2 %v4997_v30  ;;  %v6453_v58 = vpop.f32.mrf.mxu3  ;;  %v3418_v63 = vor.u32 %v4408_v20, %v3417_v53  ;;  %v2422_v35 = vpop.f32.mrf.mxu0 }
  0xfd   :  { %2651 = vmatpush.bf16.msra.mxu0 %v3242_v48  ;;  %2679 = vmatpush.bf16.msra.mxu2 %v3946_v49  ;;  %v3066_v48 = vor.u32 %v4320_v36, %v3065_v34  ;;  %v3770_v49 = vor.u32 %v4496_v38, %v3769_v37  ;;  %v3637_v34 = vld [vmem:[%s6962_s1 + $0x5a0] sm:$0xf]  ;;  %v4463_v37 = vld [vmem:[%s6962_s1 + $0x5c8] sm:$0xf0] }
  0xfe   :  { %2603 = vmatmul.bf16.vlgmr.msrb.gmra.mxu1 %v4972_v18  ;;  %4270 = vmatmul.msk.bf16.vlgmr.msrb.gmra.mxu0 %vm2162_vm2, %v4921_v60  ;;  %v4447_v38 = vld [vmem:[%s6962_s1 + $0x54c] sm:$0xf]  ;;  %v3638_v56 = vor.u32 %v4463_v37, %v3637_v34  ;;  %v3111_v34 = vld [vmem:[%s6962_s1 + $0x1ac] sm:$0xf0]  ;;  %v4414_v37 = vld [vmem:[%s6962_s1 + $0x444] sm:$0xf] }
  0xff   :  { %2665 = vmatpush.bf16.msra.mxu1 %v3594_v44  ;;  %2631 = vmatmul.bf16.vlgmr.msrb.gmra.mxu3 %v4955_v11  ;;  %v2325_v44 = vadd.f32 %v6354_v6, %v398_v39  ;;  %v3373_v6 = vld [vmem:[%s6962_s1 + $0x390] sm:$0xf]  ;;  %v2380_v8 = vpop.f32.mrf.mxu1  ;;  %v4348_v39 = vld [vmem:[%s6962_s1 + $0x234] sm:$0xf] }
 0x100   :  { %2694 = vmatpush.bf16.msra.mxu3 %v2195_v43  ;;  %v399_v43 = vperm.slane %v5968_v31, 3  ;;  %v3374_v22 = vor.u32 %v4397_v7, %v3373_v6  ;;  %v2341_v7 = vadd.f32 %v6453_v58, %v2327_v47  ;;  %v4601_v31 = vld [vmem:[%s6962_s1 + $0xa1c] sm:$0xf]  ;;  %v4123_v47 = vld [vmem:[%s6962_s1 + $0x994] sm:$0xf0] }
 0x101   :  { %2652 = vmatpush.bf16.msra.mxu0 %v3198_v0  ;;  %2680 = vmatpush.bf16.msra.mxu2 %v3902_v1  ;;  %v4033_v0 = vld [vmem:[%s6962_s1 + $0x8b8] sm:$0xf]  ;;  %v4562_v1 = vld [vmem:[%s6962_s1 + $0x8e0] sm:$0xf0] }
 0x102   :  { %v2381_v3 = vadd.f32 %v2380_v8, %v399_v43  ;;  %v4034_v21 = vor.u32 %v4562_v1, %v4033_v0 }
 0x103   :  { %2666 = vmatpush.bf16.msra.mxu1 %v3550_v14  ;;  %v4474_v14 = vld [vmem:[%s6962_s1 + $0x620] sm:$0xf0] }
 0x104   :  { %2695 = vmatpush.bf16.msra.mxu3 %v4210_v12  ;;  %v3681_v12 = vld [vmem:[%s6962_s1 + $0x5f8] sm:$0xf] }
 0x105   :  { %2653 = vmatpush.bf16.msra.mxu0 %v3154_v16  ;;  %2681 = vmatpush.bf16.msra.mxu2 %v3858_v17  ;;  %v4551_v16 = vld [vmem:[%s6962_s1 + $0x888] sm:$0xf0]  ;;  %v2339_v17 = vadd.f32 %v6374_v50, %v2325_v44  ;;  %v3682_v50 = vor.u32 %v4474_v14, %v3681_v12  ;;  %v2394_v29 = vpop.f32.mrf.mxu2  ;;  %v3199_v44 = vld [vmem:[%s6962_s1 + $0x25c] sm:$0xf0] }
 0x106   :  { %v2395_v61 = vadd.f32 %v2394_v29, %v2381_v3  ;;  %v3990_v36 = vor.u32 %v4551_v16, %v3989_v15  ;;  %v2408_v53 = vpop.f32.mrf.mxu3  ;;  %v3202_v9 = vor.u32 %v4348_v39, %v3199_v44  ;;  %v3155_v15 = vld [vmem:[%s6962_s1 + $0x204] sm:$0xf0]  ;;  %v4524_v16 = vld [vmem:[%s6962_s1 + $0x7b4] sm:$0xf]  ;;  %v4502_v39 = vld [vmem:[%s6962_s1 + $0x704] sm:$0xf] }
 0x107   :  { %2667 = vmatpush.bf16.msra.mxu1 %v3506_v27  ;;  %v3329_v27 = vld [vmem:[%s6962_s1 + $0x338] sm:$0xf]  ;;  %v2353_v46 = vadd.f32 %v6366_v10, %v2339_v17  ;;  %v2382_v45 = vpop.f32.mrf.mxu1  ;;  %v3903_v17 = vld [vmem:[%s6962_s1 + $0x7dc] sm:$0xf0] }
 0x108   :  { %2696 = vmatpush.bf16.msra.mxu3 %v4166_v26  ;;  %v3243_v26 = vld [vmem:[%s6962_s1 + $0x2b4] sm:$0xf0]  ;;  %v2409_v40 = vadd.f32 %v2408_v53, %v2395_v61  ;;  %v2383_v0 = vadd.f32 %v2382_v45, %v399_v43  ;;  %v4211_v43 = vld [vmem:[%s6962_s1 + $0xa44] sm:$0xf0]  ;;  %v3906_v29 = vor.u32 %v4524_v16, %v3903_v17  ;;  %v4513_v61 = vld [vmem:[%s6962_s1 + $0x75c] sm:$0xf] }
 0x109   :  { %2654 = vmatpush.bf16.msra.mxu0 %v3110_v32  ;;  %2682 = vmatpush.bf16.msra.mxu2 %v3814_v33  ;;  %v2933_v32 = vld [vmem:[%s6962_s1 + $0x20] sm:$0xf]  ;;  %v4287_v33 = vld [vmem:[%s6962_s1 + $0x48] sm:$0xf0]  ;;  %v3246_v20 = vor.u32 %v4359_v23, %v3243_v26  ;;  %v2367_v6 = vadd.f32 %v6327_v55, %v2353_v46  ;;  %v4337_v55 = vld [vmem:[%s6962_s1 + $0x1dc] sm:$0xf] }
 0x10a   :  { %v2934_v10 = vor.u32 %v4287_v33, %v2933_v32  ;;  %v2423_v8 = vadd.f32 %v2422_v35, %v2409_v40  ;;  %v4425_v23 = vld [vmem:[%s6962_s1 + $0x49c] sm:$0xf]  ;;  %v3859_v35 = vld [vmem:[%s6962_s1 + $0x784] sm:$0xf0]  ;;  %v4579_v46 = vld [vmem:[%s6962_s1 + $0x96c] sm:$0xf] }
 0x10b   :  { %2668 = vmatpush.bf16.msra.mxu1 %v3462_v42  ;;  %v4258_v42 = vor.u32 %v4612_v24, %v4255_v25  ;;  %v3507_v24 = vld [vmem:[%s6962_s1 + $0x4c4] sm:$0xf0]  ;;  %v2355_v25 = vadd.f32 %v6433_v51, %v2341_v7  ;;  %v4326_v51 = vld [vmem:[%s6962_s1 + $0x184] sm:$0xf]  ;;  %v4315_v53 = vld [vmem:[%s6962_s1 + $0x12c] sm:$0xf]  ;;  %v4126_v45 = vor.u32 %v4579_v46, %v4123_v47 }
 0x10c   :  { %2697 = vmatpush.bf16.msra.mxu3 %v4122_v41  ;;  %v3595_v41 = vld [vmem:[%s6962_s1 + $0x574] sm:$0xf0]  ;;  %v2820_v58 = vpack.c.bf16 %v2423_v8, %v2367_v6  ;;  %v3510_v33 = vor.u32 %v4425_v23, %v3507_v24  ;;  %v3815_v40 = vld [vmem:[%s6962_s1 + $0x72c] sm:$0xf0]  ;;  %v4491_v6 = vld [vmem:[%s6962_s1 + $0x6ac] sm:$0xf] }
 0x10d   :  { %2655 = vmatpush.bf16.msra.mxu0 %v3066_v48  ;;  %2683 = vmatpush.bf16.msra.mxu2 %v3770_v49  ;;  %v3330_v48 = vor.u32 %v4386_v28, %v3329_v27  ;;  %v3285_v49 = vld [vmem:[%s6962_s1 + $0x2e0] sm:$0xf]  ;;  %v3598_v57 = vor.u32 %v4447_v38, %v3595_v41  ;;  %v2198_v1 = vand.u32 %v4258_v42, %v4710_v19  ;;  %v2396_v14 = vpop.f32.mrf.mxu2  ;;  %v2424_v27 = vpop.f32.mrf.mxu0  ;;  %v3463_v38 = vld [vmem:[%s6962_s1 + $0x46c] sm:$0xf0]  ;;  %v3771_v7 = vld [vmem:[%s6962_s1 + $0x6d4] sm:$0xf0] }
 0x10e   :  { %2832 = vst [vmem:[#allocation2 + $0x8] sm:$0xff] %v2820_v58  ;;  %v2410_v26 = vpop.f32.mrf.mxu3  ;;  %v3158_v28 = vor.u32 %v4337_v55, %v3155_v15  ;;  %v2369_v41 = vadd.f32 %v6398_v62, %v2355_v25  ;;  %v3466_v62 = vor.u32 %v4414_v37, %v3463_v38  ;;  %v3774_v58 = vor.u32 %v4491_v6, %v3771_v7  ;;  %v4381_v16 = vld [vmem:[%s6962_s1 + $0x33c] sm:$0xf]  ;;  %v4480_v17 = vld [vmem:[%s6962_s1 + $0x654] sm:$0xf] }
 0x10f   :  { %2669 = vmatpush.bf16.msra.mxu1 %v3418_v63  ;;  %v3947_v63 = vld [vmem:[%s6962_s1 + $0x834] sm:$0xf0]  ;;  %v3331_v23 = vld [vmem:[%s6962_s1 + $0x364] sm:$0xf0]  ;;  %v4546_v24 = vld [vmem:[%s6962_s1 + $0x864] sm:$0xf] }
 0x110   :  { %2698 = vmatpush.bf16.msra.mxu3 %v4078_v59  ;;  %v4535_v59 = vld [vmem:[%s6962_s1 + $0x80c] sm:$0xf]  ;;  %v3991_v25 = vld [vmem:[%s6962_s1 + $0x88c] sm:$0xf0]  ;;  %v4261_v38 = vld [vmem:[%s6962_s1 + $0xa78] sm:$0xf] }
 0x111   :  { %2656 = vmatpush.bf16.msra.mxu0 %v3022_v4  ;;  %2684 = vmatpush.bf16.msra.mxu2 %v3726_v2  ;;  %v3286_v4 = vor.u32 %v4375_v52, %v3285_v49  ;;  %v4436_v2 = vld [vmem:[%s6962_s1 + $0x4f4] sm:$0xf]  ;;  %v3950_v12 = vor.u32 %v4535_v59, %v3947_v63  ;;  %v3114_v49 = vor.u32 %v4326_v51, %v3111_v34  ;;  %v4079_v63 = vld [vmem:[%s6962_s1 + $0x93c] sm:$0xf0]  ;;  %v3601_v51 = vld [vmem:[%s6962_s1 + $0x550] sm:$0xf] }
 0x112   :  { %v3554_v3 = vor.u32 %v4436_v2, %v3551_v5  ;;  %v3862_v52 = vor.u32 %v4513_v61, %v3859_v35  ;;  %v4568_v59 = vld [vmem:[%s6962_s1 + $0x914] sm:$0xf]  ;;  %v3023_v5 = vld [vmem:[%s6962_s1 + $0xfc] sm:$0xf0]  ;;  %v4370_v34 = vld [vmem:[%s6962_s1 + $0x2e4] sm:$0xf] }
 0x113   :  { %2670 = vmatpush.bf16.msra.mxu1 %v3374_v22  ;;  %v4214_v22 = vor.u32 %v4601_v31, %v4211_v43  ;;  %v4082_v8 = vor.u32 %v4568_v59, %v4079_v63  ;;  %v4392_v31 = vld [vmem:[%s6962_s1 + $0x394] sm:$0xf]  ;;  %v3375_v43 = vld [vmem:[%s6962_s1 + $0x3bc] sm:$0xf0]  ;;  %v4469_v61 = vld [vmem:[%s6962_s1 + $0x5fc] sm:$0xf] }
 0x114   :  { %2699 = vmatpush.bf16.msra.mxu3 %v4034_v21  ;;  %v2397_v21 = vadd.f32 %v2396_v14, %v2383_v0  ;;  %v4293_v14 = vld [vmem:[%s6962_s1 + $0x7c] sm:$0xf]  ;;  %v3378_v15 = vor.u32 %v4392_v31, %v3375_v43  ;;  %v3683_v35 = vld [vmem:[%s6962_s1 + $0x624] sm:$0xf0]  ;;  %v3287_v37 = vld [vmem:[%s6962_s1 + $0x30c] sm:$0xf0] }
 0x115   :  { %2657 = vmatpush.bf16.msra.mxu0 %v2978_v13  ;;  %2685 = vmatpush.bf16.msra.mxu2 %v3682_v50  ;;  %v4590_v13 = vld [vmem:[%s6962_s1 + $0x9c4] sm:$0xf]  ;;  %v4167_v50 = vld [vmem:[%s6962_s1 + $0x9ec] sm:$0xf0]  ;;  %v4541_v47 = vld [vmem:[%s6962_s1 + $0x838] sm:$0xf0] }
 0x116   :  { %v2411_v32 = vadd.f32 %v2410_v26, %v2397_v21  ;;  %v3727_v21 = vld [vmem:[%s6962_s1 + $0x67c] sm:$0xf0]  ;;  %v4282_v26 = vld [vmem:[%s6962_s1 + $0x24] sm:$0xf]  ;;  %v3953_v46 = vld [vmem:[%s6962_s1 + $0x810] sm:$0xf] }
 0x117   :  { %2671 = vmatpush.bf16.msra.mxu1 %v3330_v48  ;;  %v2848_v48 = vld [vmem:[#allocation2 + $0x34] sm:$0x77]  ;;  %v4530_v63 = vld [vmem:[%s6962_s1 + $0x7e0] sm:$0xf0]  ;;  %v3513_v6 = vld [vmem:[%s6962_s1 + $0x4a0] sm:$0xf] }
 0x118   :  { %2700 = vmatpush.bf16.msra.mxu3 %v3990_v36  ;;  %v4170_v36 = vor.u32 %v4590_v13, %v4167_v50  ;;  %v2425_v42 = vadd.f32 %v2424_v27, %v2411_v32  ;;  %v3249_v13 = vld [vmem:[%s6962_s1 + $0x290] sm:$0xf]  ;;  %v4365_v50 = vld [vmem:[%s6962_s1 + $0x2b8] sm:$0xf0]  ;;  %v3909_v59 = vld [vmem:[%s6962_s1 + $0x7b8] sm:$0xf] }
 0x119   :  { %2658 = vmatpush.bf16.msra.mxu0 %v2934_v10  ;;  %2686 = vmatpush.bf16.msra.mxu2 %v3638_v56  ;;  %v3067_v10 = vld [vmem:[%s6962_s1 + $0x154] sm:$0xf0]  ;;  %v4403_v56 = vld [vmem:[%s6962_s1 + $0x3ec] sm:$0xf]  ;;  %v4453_v32 = vld [vmem:[%s6962_s1 + $0x578] sm:$0xf0]  ;;  %v3910_v31 = vor.u32 %v4530_v63, %v3909_v59 }
 0x11a   :  { %v3070_v0 = vor.u32 %v4315_v53, %v3067_v10  ;;  %v4354_v53 = vld [vmem:[%s6962_s1 + $0x260] sm:$0xf0]  ;;  %v4431_v43 = vld [vmem:[%s6962_s1 + $0x4c8] sm:$0xf0] }
 0x11b   :  { %4271 = vmatmul.msk.bf16.vlgmr.msra.gmra.mxu3 %vm2162_vm2, %v4921_v60  ;;  %2672 = vmatpush.bf16.msra.mxu1 %v3286_v4  ;;  %v4304_v4 = vld [vmem:[%s6962_s1 + $0xd4] sm:$0xf]  ;;  %v4458_v10 = vld [vmem:[%s6962_s1 + $0x5a4] sm:$0xf] }
 0x11c   :  { %2707 = vmatpush.bf16.msrb.mxu3 %v3246_v20  ;;  %2659 = vmatmul.bf16.vlgmr.msra.gmra.mxu0 %v4972_v18  ;;  %v2826_v20 = vpack.c.bf16 %v2425_v42, %v2369_v41  ;;  %v3026_v55 = vor.u32 %v4304_v4, %v3023_v5  ;;  %v4618_v41 = vld [vmem:[%s6962_s1 + $0xaa0] sm:$0xf0]  ;;  %v3250_v42 = vor.u32 %v4365_v50, %v3249_v13  ;;  %v4343_v4 = vld [vmem:[%s6962_s1 + $0x208] sm:$0xf0]  ;;  %v4596_v13 = vld [vmem:[%s6962_s1 + $0x9f0] sm:$0xf0] }
 0x11d   :  { %2721 = vmatpush.bf16.msrb.mxu0 %v3598_v57  ;;  %2750 = vmatpush.bf16.msrb.mxu2 %v2198_v1  ;;  %v3419_v57 = vld [vmem:[%s6962_s1 + $0x414] sm:$0xf0]  ;;  %v3818_v1 = vor.u32 %v4502_v39, %v3815_v40  ;;  %v3639_v39 = vld [vmem:[%s6962_s1 + $0x5cc] sm:$0xf0]  ;;  %v4262_v40 = vor.u32 %v4618_v41, %v4261_v38  ;;  %v4497_v41 = vld [vmem:[%s6962_s1 + $0x6d8] sm:$0xf0] }
 0x11e   :  { %2687 = vmatmul.bf16.vlgmr.msra.gmra.mxu2 %v4955_v11  ;;  %2673 = vmatmul.bf16.vlgmr.msra.gmra.mxu1 %v4997_v30  ;;  %v2849_v44 = vsel %vm6210_vm9, %v2826_v20, %v2848_v48  ;;  %v3422_v2 = vor.u32 %v4403_v56, %v3419_v57  ;;  %v3602_v20 = vor.u32 %v4453_v32, %v3601_v51  ;;  %v3557_v56 = vld [vmem:[%s6962_s1 + $0x4f8] sm:$0xf]  ;;  %v4442_v57 = vld [vmem:[%s6962_s1 + $0x520] sm:$0xf0]  ;;  %v6772_v7 = vpop.f32.mrf.mxu0  ;;  %v3777_v38 = vld [vmem:[%s6962_s1 + $0x6b0] sm:$0xf] }
 0x11f   :  { %2735 = vmatpush.bf16.msrb.mxu1 %v3950_v12  ;;  %2850 = vst [vmem:[#allocation2 + $0x34] sm:$0x77] %v2849_v44  ;;  %v4035_v12 = vld [vmem:[%s6962_s1 + $0x8e4] sm:$0xf0]  ;;  %v2201_v5 = vand.u32 %v4262_v40, %v4710_v19  ;;  %v4217_v19 = vld [vmem:[%s6962_s1 + $0xa20] sm:$0xf] }
 0x120   :  { %2708 = vmatpush.bf16.msrb.mxu3 %v3202_v9  ;;  %v4557_v9 = vld [vmem:[%s6962_s1 + $0x8bc] sm:$0xf]  ;;  %v4398_v40 = vld [vmem:[%s6962_s1 + $0x3c0] sm:$0xf0] }
 0x121   :  { %2722 = vmatpush.bf16.msrb.mxu0 %v3554_v3  ;;  %2751 = vmatpush.bf16.msrb.mxu2 %v4214_v22  ;;  %v2979_v3 = vld [vmem:[%s6962_s1 + $0xa4] sm:$0xf0]  ;;  %v4038_v22 = vor.u32 %v4557_v9, %v4035_v12  ;;  %v4607_v9 = vld [vmem:[%s6962_s1 + $0xa48] sm:$0xf0]  ;;  %v4486_v59 = vld [vmem:[%s6962_s1 + $0x680] sm:$0xf0] }
 0x122   :  { %v2982_v27 = vor.u32 %v4293_v14, %v2979_v3  ;;  %v6794_v14 = vpop.f32.mrf.mxu1  ;;  %v3117_v3 = vld [vmem:[%s6962_s1 + $0x188] sm:$0xf] }
 0x123   :  { %2736 = vmatpush.bf16.msrb.mxu1 %v3906_v29  ;;  %v2935_v29 = vld [vmem:[%s6962_s1 + $0x4c] sm:$0xf0] }
 0x124   :  { %2709 = vmatpush.bf16.msrb.mxu3 %v3158_v28  ;;  %v3730_v28 = vor.u32 %v4480_v17, %v3727_v21  ;;  %v2938_v48 = vor.u32 %v4282_v26, %v2935_v29  ;;  %v4218_v17 = vor.u32 %v4607_v9, %v4217_v19  ;;  %v3469_v21 = vld [vmem:[%s6962_s1 + $0x448] sm:$0xf]  ;;  %v4321_v29 = vld [vmem:[%s6962_s1 + $0x158] sm:$0xf0]  ;;  %v4563_v19 = vld [vmem:[%s6962_s1 + $0x8e8] sm:$0xf0] }
 0x125   :  { %2723 = vmatpush.bf16.msrb.mxu0 %v3510_v33  ;;  %2752 = vmatpush.bf16.msrb.mxu2 %v4170_v36  ;;  %v3334_v33 = vor.u32 %v4381_v16, %v3331_v23  ;;  %v3994_v36 = vor.u32 %v4546_v24, %v3991_v25  ;;  %v3514_v16 = vor.u32 %v4431_v43, %v3513_v6  ;;  %v4420_v24 = vld [vmem:[%s6962_s1 + $0x470] sm:$0xf0]  ;;  %v4173_v25 = vld [vmem:[%s6962_s1 + $0x9c8] sm:$0xf]  ;;  %v3337_v6 = vld [vmem:[%s6962_s1 + $0x340] sm:$0xf] }
 0x126   :  { %v3821_v26 = vld [vmem:[%s6962_s1 + $0x708] sm:$0xf]  ;;  %v3470_v51 = vor.u32 %v4420_v24, %v3469_v21  ;;  %v4174_v32 = vor.u32 %v4596_v13, %v4173_v25  ;;  %v4041_v43 = vld [vmem:[%s6962_s1 + $0x8c0] sm:$0xf] }
 0x127   :  { %2737 = vmatpush.bf16.msrb.mxu1 %v3862_v52  ;;  %v3205_v52 = vld [vmem:[%s6962_s1 + $0x238] sm:$0xf]  ;;  %v3293_v24 = vld [vmem:[%s6962_s1 + $0x2e8] sm:$0xf] }
 0x128   :  { %2710 = vmatpush.bf16.msrb.mxu3 %v3114_v49  ;;  %v3686_v49 = vor.u32 %v4469_v61, %v3683_v35  ;;  %v3206_v44 = vor.u32 %v4354_v53, %v3205_v52  ;;  %v4409_v61 = vld [vmem:[%s6962_s1 + $0x418] sm:$0xf0]  ;;  %v4129_v35 = vld [vmem:[%s6962_s1 + $0x970] sm:$0xf]  ;;  %v4310_v52 = vld [vmem:[%s6962_s1 + $0x100] sm:$0xf0] }
 0x129   :  { %2724 = vmatpush.bf16.msrb.mxu0 %v3466_v62  ;;  %2753 = vmatpush.bf16.msrb.mxu2 %v4126_v45  ;;  %v3290_v62 = vor.u32 %v4370_v34, %v3287_v37  ;;  %v3954_v45 = vor.u32 %v4541_v47, %v3953_v46  ;;  %v2438_v47 = vpop.f32.mrf.mxu0 }
 0x12b   :  { %2738 = vmatpush.bf16.msrb.mxu1 %v3818_v1  ;;  %v3161_v1 = vld [vmem:[%s6962_s1 + $0x1e0] sm:$0xf] }
 0x12c   :  { %2711 = vmatpush.bf16.msrb.mxu3 %v3070_v0  ;;  %v3642_v0 = vor.u32 %v4458_v10, %v3639_v39  ;;  %v3162_v12 = vor.u32 %v4343_v4, %v3161_v1  ;;  %v2452_v10 = vpop.f32.mrf.mxu1  ;;  %v3778_v39 = vor.u32 %v4497_v41, %v3777_v38  ;;  %v2985_v1 = vld [vmem:[%s6962_s1 + $0x80] sm:$0xf]  ;;  %v4299_v4 = vld [vmem:[%s6962_s1 + $0xa8] sm:$0xf0] }
 0x12d   :  { %2725 = vmatpush.bf16.msrb.mxu0 %v3422_v2  ;;  %2754 = vmatpush.bf16.msrb.mxu2 %v4082_v8  ;;  %v3558_v2 = vor.u32 %v4442_v57, %v3557_v56  ;;  %v6774_v8 = vpop.f32.mrf.mxu3  ;;  %v4574_v56 = vld [vmem:[%s6962_s1 + $0x940] sm:$0xf0] }
 0x12f   :  { %2739 = vmatpush.bf16.msrb.mxu1 %v3774_v58  ;;  %v4519_v58 = vld [vmem:[%s6962_s1 + $0x788] sm:$0xf0] }
 0x130   :  { %2712 = vmatpush.bf16.msrb.mxu3 %v3026_v55  ;;  %v3865_v55 = vld [vmem:[%s6962_s1 + $0x760] sm:$0xf] }
 0x131   :  { %2726 = vmatpush.bf16.msrb.mxu0 %v3378_v15  ;;  %2755 = vmatpush.bf16.msrb.mxu2 %v4038_v22  ;;  %v4332_v15 = vld [vmem:[%s6962_s1 + $0x1b0] sm:$0xf0]  ;;  %v6806_v22 = vpop.f32.mrf.mxu2  ;;  %v3866_v23 = vor.u32 %v4519_v58, %v3865_v55  ;;  %v3689_v55 = vld [vmem:[%s6962_s1 + $0x600] sm:$0xf]  ;;  %v4475_v58 = vld [vmem:[%s6962_s1 + $0x628] sm:$0xf0] }
 0x132   :  { %v3118_v50 = vor.u32 %v4332_v15, %v3117_v3 }
 0x133   :  { %2740 = vmatpush.bf16.msrb.mxu1 %v3730_v28  ;;  %v3073_v28 = vld [vmem:[%s6962_s1 + $0x130] sm:$0xf] }
 0x134   :  { %2713 = vmatpush.bf16.msrb.mxu3 %v2982_v27  ;;  %v4508_v27 = vld [vmem:[%s6962_s1 + $0x730] sm:$0xf0]  ;;  %v3074_v37 = vor.u32 %v4321_v29, %v3073_v28 }
 0x135   :  { %2727 = vmatpush.bf16.msrb.mxu0 %v3334_v33  ;;  %2756 = vmatpush.bf16.msrb.mxu2 %v3994_v36  ;;  %v3425_v33 = vld [vmem:[%s6962_s1 + $0x3f0] sm:$0xf]  ;;  %v3822_v34 = vor.u32 %v4508_v27, %v3821_v26  ;;  %v4585_v36 = vld [vmem:[%s6962_s1 + $0x998] sm:$0xf0]  ;;  %v3997_v26 = vld [vmem:[%s6962_s1 + $0x868] sm:$0xf] }
 0x136   :  { %v3426_v53 = vor.u32 %v4409_v61, %v3425_v33  ;;  %v4552_v27 = vld [vmem:[%s6962_s1 + $0x890] sm:$0xf0] }
 0x137   :  { %2741 = vmatpush.bf16.msrb.mxu1 %v3686_v49  ;;  %v3029_v49 = vld [vmem:[%s6962_s1 + $0xd8] sm:$0xf] }
 0x138   :  { %2714 = vmatpush.bf16.msrb.mxu3 %v2938_v48  ;;  %4272 = vmatmul.msk.bf16.vlgmr.msrb.gmra.mxu2 %vm2162_vm2, %v4921_v60  ;;  %v6854_v48 = vpop.f32.mrf.mxu3  ;;  %v3030_v57 = vor.u32 %v4310_v52, %v3029_v49 }
 0x139   :  { %2763 = vmatpush.bf16.msra.mxu2 %v3250_v42  ;;  %2728 = vmatpush.bf16.msrb.mxu0 %v3290_v62  ;;  %v6851_v42 = vld [vmem:[%s6963_s2] sm:$0xff]  ;;  %v3381_v62 = vld [vmem:[%s6962_s1 + $0x398] sm:$0xf] }
 0x13a   :  { %v400_v46 = vperm.slane %v6851_v42, 4  ;;  %v401_v9 = vperm.slane %v6851_v42, 5 }
 0x13b   :  { %2715 = vmatmul.bf16.vlgmr.msrb.gmra.mxu3 %v4972_v18  ;;  %2742 = vmatpush.bf16.msrb.mxu1 %v3642_v0  ;;  %v6883_v0 = vpop.f32.mrf.mxu2 }
 0x13c   :  { %2777 = vmatpush.bf16.msra.mxu3 %v3602_v20  ;;  %2729 = vmatmul.bf16.vlgmr.msrb.gmra.mxu0 %v4997_v30  ;;  %v4130_v20 = vor.u32 %v4585_v36, %v4129_v35  ;;  %v2437_v63 = vadd.f32 %v6772_v7, %v400_v46  ;;  %v2439_v35 = vadd.f32 %v2438_v47, %v400_v46 }
 0x13d   :  { %2791 = vmatpush.bf16.msra.mxu0 %v3954_v45  ;;  %2764 = vmatpush.bf16.msra.mxu2 %v3206_v44  ;;  %v4085_v45 = vld [vmem:[%s6962_s1 + $0x918] sm:$0xf]  ;;  %v2506_v15 = vpop.f32.mrf.mxu0 }
 0x13e   :  { %2743 = vmatmul.bf16.vlgmr.msrb.gmra.mxu1 %v4955_v11  ;;  %v3733_v44 = vld [vmem:[%s6962_s1 + $0x658] sm:$0xf]  ;;  %v2451_v3 = vadd.f32 %v6794_v14, %v2437_v63  ;;  %v4376_v14 = vld [vmem:[%s6962_s1 + $0x310] sm:$0xf0]  ;;  %v2453_v52 = vadd.f32 %v2452_v10, %v2439_v35 }
 0x13f   :  { %2806 = vmatpush.bf16.msra.mxu1 %v2201_v5  ;;  %v4086_v5 = vor.u32 %v4574_v56, %v4085_v45  ;;  %v3734_v7 = vor.u32 %v4486_v59, %v3733_v44  ;;  %v2520_v13 = vpop.f32.mrf.mxu1  ;;  %v3294_v61 = vor.u32 %v4376_v14, %v3293_v24  ;;  %v2851_v56 = vld [vmem:[#allocation2 + $0x3c] sm:$0x77] }
 0x140   :  { %2778 = vmatpush.bf16.msra.mxu3 %v3558_v2  ;;  %v3382_v2 = vor.u32 %v4398_v40, %v3381_v62  ;;  %v2465_v33 = vadd.f32 %v6806_v22, %v2451_v3 }
 0x141   :  { %2792 = vmatpush.bf16.msra.mxu0 %v3910_v31  ;;  %2765 = vmatpush.bf16.msra.mxu2 %v3162_v12  ;;  %v4387_v31 = vld [vmem:[%s6962_s1 + $0x368] sm:$0xf0]  ;;  %v2986_v12 = vor.u32 %v4299_v4, %v2985_v1  ;;  %v402_v1 = vperm.slane %v6851_v42, 6 }
 0x142   :  { %v3338_v21 = vor.u32 %v4387_v31, %v3337_v6  ;;  %v2492_v25 = vpop.f32.mrf.mxu3  ;;  %v2479_v49 = vadd.f32 %v6774_v8, %v2465_v33 }
 0x143   :  { %2807 = vmatpush.bf16.msra.mxu1 %v4218_v17  ;;  %v4288_v17 = vld [vmem:[%s6962_s1 + $0x50] sm:$0xf0]  ;;  %v2493_v28 = vadd.f32 %v2492_v25, %v401_v9 }
 0x144   :  { %2779 = vmatpush.bf16.msra.mxu3 %v3514_v16  ;;  %v2941_v16 = vld [vmem:[%s6962_s1 + $0x28] sm:$0xf] }
 0x145   :  { %2793 = vmatpush.bf16.msra.mxu0 %v3866_v23  ;;  %2766 = vmatpush.bf16.msra.mxu2 %v3118_v50  ;;  %v4042_v23 = vor.u32 %v4563_v19, %v4041_v43  ;;  %v3690_v50 = vor.u32 %v4475_v58, %v3689_v55  ;;  %v2942_v29 = vor.u32 %v4288_v17, %v2941_v16 }
 0x146   :  { %v2507_v36 = vadd.f32 %v2506_v15, %v2493_v28 }
 0x147   :  { %2808 = vmatpush.bf16.msra.mxu1 %v4174_v32  ;;  %v4464_v32 = vld [vmem:[%s6962_s1 + $0x5d0] sm:$0xf0]  ;;  %v2522_v62 = vpop.f32.mrf.mxu1 }
 0x148   :  { %2780 = vmatpush.bf16.msra.mxu3 %v3470_v51  ;;  %v3645_v51 = vld [vmem:[%s6962_s1 + $0x5a8] sm:$0xf]  ;;  %v2521_v41 = vadd.f32 %v2520_v13, %v2507_v36 }
 0x149   :  { %2794 = vmatpush.bf16.msra.mxu0 %v3822_v34  ;;  %2767 = vmatpush.bf16.msra.mxu2 %v3074_v37  ;;  %v2534_v34 = vpop.f32.mrf.mxu2  ;;  %v3998_v37 = vor.u32 %v4552_v27, %v3997_v26  ;;  %v3646_v38 = vor.u32 %v4464_v32, %v3645_v51  ;;  %v393_v36 = vld [vmem:[%s6963_s2 + $0x8] sm:$0x7]  ;;  %s4651_s2 = smov [#allocation2]  }
 0x14a   :  { %v2494_v22 = vpop.f32.mrf.mxu3  ;;  %s2869_s5 = sshll.u32 %s4651_s2, 4  ;;  %s2870_s5 = int_to_ptr.vmem [resolvable:$true] %s2869_s5 }
 0x14b   :  { %2809 = vmatpush.bf16.msra.mxu1 %v4130_v20  ;;  %v2508_v20 = vpop.f32.mrf.mxu0  ;;  %v2495_v47 = vadd.f32 %v2494_v22, %v401_v9  ;;  %v405_v22 = vperm.slane %v393_v36, 1 }
 0x14c   :  { %2781 = vmatpush.bf16.msra.mxu3 %v3426_v53  ;;  %v2535_v53 = vadd.f32 %v2534_v34, %v2521_v41  ;;  %v404_v41 = vperm.slane %v393_v36, 0 }
 0x14d   :  { %2795 = vmatpush.bf16.msra.mxu0 %v3778_v39  ;;  %2768 = vmatpush.bf16.msra.mxu2 %v3030_v57  ;;  %v2467_v39 = vadd.f32 %v6883_v0, %v2453_v52  ;;  %v2509_v8 = vadd.f32 %v2508_v20, %v2495_v47 }
 0x14e   :  { %v2821_v46 = vpack.c.bf16 %v2535_v53, %v2479_v49 }
 0x14f   :  { %2810 = vmatpush.bf16.msra.mxu1 %v4086_v5  ;;  %v2523_v40 = vadd.f32 %v2522_v62, %v2509_v8 }
 0x150   :  { %2782 = vmatpush.bf16.msra.mxu3 %v3382_v2  ;;  %2833 = vst [vmem:[#allocation2 + $0x10] sm:$0xff] %v2821_v46 }
 0x151   :  { %2796 = vmatpush.bf16.msra.mxu0 %v3734_v7  ;;  %2769 = vmatpush.bf16.msra.mxu2 %v2986_v12  ;;  %v2536_v10 = vpop.f32.mrf.mxu2 }
 0x152   :  { %v2537_v45 = vadd.f32 %v2536_v10, %v2523_v40 }
 0x153   :  { %2811 = vmatpush.bf16.msra.mxu1 %v4042_v23 }
 0x154   :  { %2783 = vmatpush.bf16.msra.mxu3 %v3338_v21 }
 0x155   :  { %2797 = vmatpush.bf16.msra.mxu0 %v3690_v50  ;;  %2770 = vmatpush.bf16.msra.mxu2 %v2942_v29  ;;  %v2854_v29 = vld [vmem:[#allocation2 + $0x44] sm:$0x77] }
 0x157   :  { %2812 = vmatpush.bf16.msra.mxu1 %v3998_v37 }
 0x158   :  { %2784 = vmatpush.bf16.msra.mxu3 %v3294_v61  ;;  %2771 = vmatmul.bf16.vlgmr.msra.gmra.mxu2 %v4972_v18  ;;  %v2481_v18 = vadd.f32 %v6854_v48, %v2467_v39  ;;  %v403_v48 = vperm.slane %v6851_v42, 7 }
 0x159   :  { %2798 = vmatpush.bf16.msra.mxu0 %v3646_v38 }
 0x15a   :  { %4273 = vmatmul.msk.bf16.vlgmr.msra.gmra.mxu1 %vm2162_vm2, %v4921_v60  ;;  %v2827_v57 = vpack.c.bf16 %v2537_v45, %v2481_v18 }
 0x15b   :  { %2785 = vmatmul.bf16.vlgmr.msra.gmra.mxu3 %v4997_v30  ;;  %v2590_v44 = vpop.f32.mrf.mxu1 }
 0x15c   :  { %2799 = vmatmul.bf16.vlgmr.msra.gmra.mxu0 %v4955_v11  ;;  %v2852_v30 = vsel %vm6210_vm9, %v2827_v57, %v2851_v56 }
 0x15d   :  { %2853 = vst [vmem:[#allocation2 + $0x3c] sm:$0x77] %v2852_v30  ;;  %v2576_v60 = vpop.f32.mrf.mxu0 }
 0x15f   :  { %v2548_v59 = vpop.f32.mrf.mxu2 }
 0x160   :  { %v2549_v5 = vadd.f32 %v2548_v59, %v402_v1 }
 0x162   :  { %v2562_v63 = vpop.f32.mrf.mxu3 }
 0x163   :  { %v2592_v0 = vpop.f32.mrf.mxu1  ;;  %v2563_v7 = vadd.f32 %v2562_v63, %v2549_v5 }
 0x165   :  { %v2578_v11 = vpop.f32.mrf.mxu0  ;;  %v2577_v12 = vadd.f32 %v2576_v60, %v2563_v7 }
 0x167   :  { %v2550_v4 = vpop.f32.mrf.mxu2  ;;  %v2591_v16 = vadd.f32 %v2590_v44, %v2577_v12 }
 0x168   :  { %v2551_v55 = vadd.f32 %v2550_v4, %v402_v1 }
 0x16a   :  { %v2564_v2 = vpop.f32.mrf.mxu3 }
 0x16b   :  { %v2565_v17 = vadd.f32 %v2564_v2, %v2551_v55 }
 0x16d   :  { %v2579_v13 = vadd.f32 %v2578_v11, %v2565_v17 }
 0x16f   :  { %v2593_v27 = vadd.f32 %v2592_v0, %v2579_v13 }
 0x17b   :  { %v2604_v6 = vpop.f32.mrf.mxu1  ;;  %v2646_v9 = vpop.f32.mrf.mxu0 }
 0x17c   :  { %v2605_v31 = vadd.f32 %v2604_v6, %v403_v48  ;;  %v2857_v6 = vld [vmem:[#allocation2 + $0x4c] sm:$0x77] }
 0x17f   :  { %v2618_v43 = vpop.f32.mrf.mxu2 }
 0x180   :  { %v2619_v19 = vadd.f32 %v2618_v43, %v2605_v31  ;;  %v406_v43 = vperm.slane %v393_v36, 2 }
 0x182   :  { %v2632_v58 = vpop.f32.mrf.mxu3 }
 0x183   :  { %v2633_v3 = vadd.f32 %v2632_v58, %v2619_v19  ;;  %v2606_v15 = vpop.f32.mrf.mxu1  ;;  %v2648_v50 = vpop.f32.mrf.mxu0 }
 0x184   :  { %v2607_v23 = vadd.f32 %v2606_v15, %v403_v48 }
 0x185   :  { %v2647_v21 = vadd.f32 %v2646_v9, %v2633_v3 }
 0x187   :  { %v2822_v24 = vpack.c.bf16 %v2647_v21, %v2591_v16  ;;  %v2620_v14 = vpop.f32.mrf.mxu2 }
 0x188   :  { %v2621_v25 = vadd.f32 %v2620_v14, %v2607_v23 }
 0x189   :  { %2834 = vst [vmem:[#allocation2 + $0x18] sm:$0xff] %v2822_v24 }
 0x18a   :  { %v2634_v42 = vpop.f32.mrf.mxu3 }
 0x18b   :  { %v2635_v26 = vadd.f32 %v2634_v42, %v2621_v25 }
 0x18d   :  { %v2649_v28 = vadd.f32 %v2648_v50, %v2635_v26  ;;  %v2862_v50 = vld [vmem:[#allocation2 + $0x54] sm:$0x7] }
 0x18f   :  { %v2828_v51 = vpack.c.bf16 %v2649_v28, %v2593_v27 }
 0x191   :  { %v2855_v32 = vsel %vm6210_vm9, %v2828_v51, %v2854_v29 }
 0x192   :  { %2856 = vst [vmem:[#allocation2 + $0x44] sm:$0x77] %v2855_v32 }
 0x199   :  { %v2660_v33 = vpop.f32.mrf.mxu0 }
 0x19a   :  { %v2661_v53 = vadd.f32 %v2660_v33, %v404_v41 }
 0x19b   :  { %v2674_v61 = vpop.f32.mrf.mxu1 }
 0x19c   :  { %v2675_v46 = vadd.f32 %v2674_v61, %v2661_v53 }
 0x19e   :  { %v2702_v34 = vpop.f32.mrf.mxu3 }
 0x1a1   :  { %v2688_v35 = vpop.f32.mrf.mxu2  ;;  %v2662_v37 = vpop.f32.mrf.mxu0 }
 0x1a2   :  { %v2689_v8 = vadd.f32 %v2688_v35, %v2675_v46  ;;  %v2663_v10 = vadd.f32 %v2662_v37, %v404_v41 }
 0x1a3   :  { %v2676_v49 = vpop.f32.mrf.mxu1 }
 0x1a4   :  { %v2703_v56 = vadd.f32 %v2702_v34, %v2689_v8  ;;  %v2677_v57 = vadd.f32 %v2676_v49, %v2663_v10 }
 0x1a6   :  { %v2704_v38 = vpop.f32.mrf.mxu3 }
 0x1a9   :  { %v2690_v52 = vpop.f32.mrf.mxu2 }
 0x1aa   :  { %v2691_v1 = vadd.f32 %v2690_v52, %v2677_v57 }
 0x1ac   :  { %v2705_v5 = vadd.f32 %v2704_v38, %v2691_v1 }
 0x1b9   :  { %v2730_v20 = vpop.f32.mrf.mxu0 }
 0x1bb   :  { %v2744_v62 = vpop.f32.mrf.mxu1  ;;  %v2758_v18 = vpop.f32.mrf.mxu2 }
 0x1be   :  { %v2716_v47 = vpop.f32.mrf.mxu3 }
 0x1bf   :  { %v2717_v39 = vadd.f32 %v2716_v47, %v405_v22 }
 0x1c1   :  { %v2731_v40 = vadd.f32 %v2730_v20, %v2717_v39  ;;  %v2732_v59 = vpop.f32.mrf.mxu0 }
 0x1c3   :  { %v2745_v45 = vadd.f32 %v2744_v62, %v2731_v40  ;;  %v2746_v0 = vpop.f32.mrf.mxu1  ;;  %v2760_v2 = vpop.f32.mrf.mxu2 }
 0x1c5   :  { %v2759_v30 = vadd.f32 %v2758_v18, %v2745_v45 }
 0x1c6   :  { %v2718_v44 = vpop.f32.mrf.mxu3 }
 0x1c7   :  { %v2823_v60 = vpack.c.bf16 %v2759_v30, %v2703_v56  ;;  %v2719_v63 = vadd.f32 %v2718_v44, %v405_v22 }
 0x1c9   :  { %2835 = vst [vmem:[#allocation2 + $0x20] sm:$0xff] %v2823_v60  ;;  %v2733_v4 = vadd.f32 %v2732_v59, %v2719_v63 }
 0x1cb   :  { %v2747_v11 = vadd.f32 %v2746_v0, %v2733_v4 }
 0x1cd   :  { %v2761_v48 = vadd.f32 %v2760_v2, %v2747_v11 }
 0x1cf   :  { %v2829_v7 = vpack.c.bf16 %v2761_v48, %v2705_v5 }
 0x1d1   :  { %v2858_v31 = vsel %vm6210_vm9, %v2829_v7, %v2857_v6 }
 0x1d2   :  { %2859 = vst [vmem:[#allocation2 + $0x4c] sm:$0x77] %v2858_v31 }
 0x1d7   :  { %v2814_v3 = vpop.f32.mrf.mxu1 }
 0x1d9   :  { %v2800_v12 = vpop.f32.mrf.mxu0 }
 0x1db   :  { %v2772_v19 = vpop.f32.mrf.mxu2 }
 0x1dc   :  { %v2773_v9 = vadd.f32 %v2772_v19, %v406_v43 }
 0x1de   :  { %v2786_v55 = vpop.f32.mrf.mxu3 }
 0x1df   :  { %v2787_v58 = vadd.f32 %v2786_v55, %v2773_v9  ;;  %v2816_v13 = vpop.f32.mrf.mxu1 }
 0x1e1   :  { %v2801_v15 = vadd.f32 %v2800_v12, %v2787_v58  ;;  %v2802_v25 = vpop.f32.mrf.mxu0 }
 0x1e3   :  { %v2815_v16 = vadd.f32 %v2814_v3, %v2801_v15  ;;  %v2774_v17 = vpop.f32.mrf.mxu2 }
 0x1e4   :  { %v2775_v23 = vadd.f32 %v2774_v17, %v406_v43 }
 0x1e5   :  { %v2824_v21 = vpack.c.bf16 %v2815_v16, %v2815_v16 }
 0x1e6   :  { %v2788_v24 = vpop.f32.mrf.mxu3 }
 0x1e7   :  { %2837 = vst.msk [vmem:[#allocation2 + $0x28] sm:$0xf] %vm2836_vm10, %v2824_v21  ;;  %v2789_v14 = vadd.f32 %v2788_v24, %v2775_v23 }
 0x1e9   :  { %v2803_v54 = vadd.f32 %v2802_v25, %v2789_v14 }
 0x1eb   :  { %v2817_v42 = vadd.f32 %v2816_v13, %v2803_v54 }
 0x1ed   :  { %v2830_v26 = vpack.c.bf16 %v2817_v42, %v2817_v42 }
 0x1ef   :  { %v2863_v27 = vsel %vm2861_vm12, %v2830_v26, %v2862_v50 }
 0x1f0   :  { %2864 = vst [vmem:[#allocation2 + $0x54] sm:$0x7] %v2863_v27 }
 0x1f1   :  { %2877 = dma.vmem_to_hbm [thread:$0]  %s2870_s5, 1408, %s2872_s7, [#allocation3], %s4652_s8, %s4652_s8, %s4653_s9  }
 0x1f2   :  { %4648 = dma.done.wait [#allocation3], 1408  }
 0x1f3   :  { %4649 = vsyncadd [#allocation3], 4294965888 }
 0x1f4   :  { %2882 = vsyncpa [#allocation3], 1 }

</bundles_post_ra>
